<compile_context>
chip_gen: v7x
topology: tpu7x:2x2x1
jax: 0.10.0
libtpu: 0.0.40
codegen_flags: <defaults>
</compile_context>

<pallas_src>
import functools
import math

import jax
import jax.numpy as jnp
from jax.experimental import pallas as pl
from jax.experimental.pallas import tpu as pltpu

LN_EPS = 1e-12  # BERT LayerNorm eps


# ---------------------------------------------------------------------------
# Fused kernel
# ---------------------------------------------------------------------------


def _layernorm(h, g, b, eps=LN_EPS):
    mu = jnp.mean(h, axis=-1, keepdims=True)
    var = jnp.mean((h - mu) * (h - mu), axis=-1, keepdims=True)
    return (h - mu) * jax.lax.rsqrt(var + eps) * g + b


def _chexbert_fused_kernel(
    # inputs shared across layers
    x_emb_ref, emb_g_ref, emb_b_ref, mask_ref,
    # per-layer (stacked) encoder weights, selected by the layer grid axis
    wqkv_ref, bqkv_ref, wo_ref, bo_ref, ln1g_ref, ln1b_ref,
    wi_ref, bi_ref, wo2_ref, bo2_ref, ln2g_ref, ln2b_ref,
    # CheXbert head
    head_w_ref, head_b_ref,
    # output + scratch
    out_ref, x_scratch,
    *, B, S, NH, Dh, H, I):
    """One encoder layer per grid step; activations live in x_scratch across steps."""
    l = pl.program_id(0)

    @pl.when(l == 0)
    def _():
        # Embedding LayerNorm fused with the start of layer 0 (no zero-residual round trip).
        x_scratch[...] = _layernorm(x_emb_ref[...], emb_g_ref[...], emb_b_ref[...])

    x = x_scratch[...]                                              # (B*S, H) f32

    # ---- self-attention (fused QKV projection) ----
    qkv = jnp.dot(x, wqkv_ref[...], preferred_element_type=jnp.float32) + bqkv_ref[...]  # (B*S, 3H)
    qkv = qkv.reshape(B, S, 3 * H)

    neg_mask = ((1.0 - mask_ref[...]) * -1e9)[:, None, :]           # (B, 1, S) additive mask
    scale = 1.0 / math.sqrt(Dh)

    ctx_heads = []
    for h in range(NH):                                             # unrolled head loop, all in vregs
        qh = qkv[:, :, h * Dh:(h + 1) * Dh]                         # (B, S, Dh)
        kh = qkv[:, :, H + h * Dh:H + (h + 1) * Dh]                 # (B, S, Dh)
        vh = qkv[:, :, 2 * H + h * Dh:2 * H + (h + 1) * Dh]         # (B, S, Dh)
        s = jnp.einsum("bqd,bkd->bqk", qh, kh,
                       preferred_element_type=jnp.float32) * scale + neg_mask
        s = s - jnp.max(s, axis=-1, keepdims=True)
        p = jnp.exp(s)
        p = p * pl.reciprocal(jnp.sum(p, axis=-1, keepdims=True), approx=True)
        ctx_heads.append(jnp.einsum("bqk,bkd->bqd", p, vh,
                                    preferred_element_type=jnp.float32))
    ctx = jnp.concatenate(ctx_heads, axis=-1).reshape(B * S, H)     # (B*S, H)

    attn_out = jnp.dot(ctx, wo_ref[...], preferred_element_type=jnp.float32) + bo_ref[...]
    x = _layernorm(attn_out + x, ln1g_ref[...], ln1b_ref[...])

    # ---- feed-forward ----
    ff = jnp.dot(x, wi_ref[...], preferred_element_type=jnp.float32) + bi_ref[...]
    # TODO(synk): HF BERT uses exact erf-GELU; tanh approximation kept for Mosaic lowering safety.
    ff = jax.nn.gelu(ff, approximate=True)
    ff_out = jnp.dot(ff, wo2_ref[...], preferred_element_type=jnp.float32) + bo2_ref[...]
    x = _layernorm(ff_out + x, ln2g_ref[...], ln2b_ref[...])

    x_scratch[...] = x

    # ---- last layer: CLS hidden -> Linear + Tanh head ----
    @pl.when(l == pl.num_programs(0) - 1)
    def _():
        # CLS token is row b*S of the (B*S, H) activation slab.
        cls = jnp.concatenate([x[b * S:b * S + 1, :] for b in range(B)], axis=0)   # (B, H)
        out_ref[...] = jnp.tanh(
            jnp.dot(cls, head_w_ref[...], preferred_element_type=jnp.float32)
            + head_b_ref[...]).astype(out_ref.dtype)


# ---------------------------------------------------------------------------
# Model: parameter setup + forward
# ---------------------------------------------------------------------------


class Config:
    vocab_size = 100
    hidden = 32
    num_layers = 2
    num_heads = 4
    head_dim = 8            # hidden // num_heads
    intermediate = 64
    max_positions = 16
    type_vocab = 2


def init_params(key, cfg):
    """Deterministic synthetic parameters (N(0, 0.02) weights, zero biases, unit LN gamma).

    Per-layer encoder weights are stacked along a leading L axis; Q/K/V are pre-fused to (H, 3H).
    """

    def nrm(key, shape):
        return 0.02 * jax.random.normal(key, shape, dtype=jnp.float32)

    H, I, L = cfg.hidden, cfg.intermediate, cfg.num_layers
    keys = iter(jax.random.split(key, 4 + 6 * L))

    params = {
        "word_emb": nrm(next(keys), (cfg.vocab_size, H)),
        "pos_emb": nrm(next(keys), (cfg.max_positions, H)),
        "type_emb": nrm(next(keys), (cfg.type_vocab, H)),
        "emb_ln_g": jnp.ones((H,), jnp.float32),
        "emb_ln_b": jnp.zeros((H,), jnp.float32),
        # CheXbert output head: Linear(hidden, hidden) + Tanh
        "head_w": nrm(next(keys), (H, H)),
        "head_b": jnp.zeros((H,), jnp.float32),
    }

    wqkv, wo, wi, wo2 = [], [], [], []
    for _ in range(L):
        wq = nrm(next(keys), (H, H))
        wk = nrm(next(keys), (H, H))
        wv = nrm(next(keys), (H, H))
        wqkv.append(jnp.concatenate([wq, wk, wv], axis=1))          # (H, 3H)
        wo.append(nrm(next(keys), (H, H)))
        wi.append(nrm(next(keys), (H, I)))
        wo2.append(nrm(next(keys), (I, H)))

    params.update({
        "wqkv": jnp.stack(wqkv),                                    # (L, H, 3H)
        "bqkv": jnp.zeros((L, 1, 3 * H), jnp.float32),
        "wo": jnp.stack(wo),                                        # (L, H, H)
        "bo": jnp.zeros((L, 1, H), jnp.float32),
        "ln1_g": jnp.ones((L, 1, H), jnp.float32),
        "ln1_b": jnp.zeros((L, 1, H), jnp.float32),
        "wi": jnp.stack(wi),                                        # (L, H, I)
        "bi": jnp.zeros((L, 1, I), jnp.float32),
        "wo2": jnp.stack(wo2),                                      # (L, I, H)
        "bo2": jnp.zeros((L, 1, H), jnp.float32),
        "ln2_g": jnp.ones((L, 1, H), jnp.float32),
        "ln2_b": jnp.zeros((L, 1, H), jnp.float32),
    })
    return params


def chexbert_forward(params, input_ids, attn_mask, cfg):
    """
    input_ids: (B, S) int32 token indices
    attn_mask: (B, S) {0,1} mask (1 = attend)
    returns:   (B, hidden) float32   (Tanh(Linear(cls_hidden))), matching CheXbert.forward
    """
    B, S = input_ids.shape
    H, NH, Dh, I = cfg.hidden, cfg.num_heads, cfg.head_dim, cfg.intermediate
    L = cfg.num_layers

    # TODO(synk): embedding table gather stays in plain XLA (data-dependent gather glue);
    # everything downstream runs in a single fused pallas_call.
    x_emb = (params["word_emb"][input_ids]
             + params["pos_emb"][:S][None, :, :]
             + params["type_emb"][0][None, None, :]).reshape(B * S, H).astype(jnp.float32)
    mask_f = attn_mask.astype(jnp.float32)                           # (B, S)

    kernel = functools.partial(_chexbert_fused_kernel, B=B, S=S, NH=NH, Dh=Dh, H=H, I=I)

    def full(shape):
        return pl.BlockSpec(shape, lambda l, _n=len(shape): (0,) * _n)

    def per_layer(shape):
        return pl.BlockSpec((None,) + shape, lambda l, _n=len(shape): (l,) + (0,) * _n)

    in_specs = [
        full((B * S, H)),        # x_emb
        full((1, H)),            # emb_ln_g
        full((1, H)),            # emb_ln_b
        full((B, S)),            # attention mask (f32 {0,1})
        per_layer((H, 3 * H)),   # wqkv
        per_layer((1, 3 * H)),   # bqkv
        per_layer((H, H)),       # wo
        per_layer((1, H)),       # bo
        per_layer((1, H)),       # ln1_g
        per_layer((1, H)),       # ln1_b
        per_layer((H, I)),       # wi
        per_layer((1, I)),       # bi
        per_layer((I, H)),       # wo2
        per_layer((1, H)),       # bo2
        per_layer((1, H)),       # ln2_g
        per_layer((1, H)),       # ln2_b
        full((H, H)),            # head_w
        full((1, H)),            # head_b
    ]

    out = pl.pallas_call(
        kernel,
        out_shape=jax.ShapeDtypeStruct((B, H), jnp.float32),
        grid=(L,),
        in_specs=in_specs,
        out_specs=pl.BlockSpec((B, H), lambda l: (0, 0)),
        scratch_shapes=[pltpu.VMEM((B * S, H), jnp.float32)],        # activations, resident across layers
        compiler_params=pltpu.CompilerParams(
            dimension_semantics=("arbitrary",)),                     # layer axis is sequential (carried state)
    )(
        x_emb,
        params["emb_ln_g"].reshape(1, H), params["emb_ln_b"].reshape(1, H),
        mask_f,
        params["wqkv"], params["bqkv"], params["wo"], params["bo"],
        params["ln1_g"], params["ln1_b"],
        params["wi"], params["bi"], params["wo2"], params["bo2"],
        params["ln2_g"], params["ln2_b"],
        params["head_w"], params["head_b"].reshape(1, H),
    )
    return out


# ---------------------------------------------------------------------------
# main
# ---------------------------------------------------------------------------

if __name__ == "__main__":
    cfg = Config()
    key = jax.random.PRNGKey(0)
    k_param, k_ids = jax.random.split(key)

    params = init_params(k_param, cfg)

    B, S = 2, 8
    input_ids = jax.random.randint(k_ids, (B, S), 0, cfg.vocab_size, dtype=jnp.int32)
    attn_mask = jnp.array(
        [[1, 1, 1, 1, 1, 1, 1, 1],
         [1, 1, 1, 1, 1, 1, 0, 0]], dtype=jnp.int32)

    out = chexbert_forward(params, input_ids, attn_mask, cfg)
    out = jax.block_until_ready(out)

    assert out.shape == (B, cfg.hidden)
    assert out.dtype == jnp.float32
    assert bool(jnp.all(jnp.isfinite(out)))
    print("KERNEL_OK")
</pallas_src>

<mosaic_0001>
module attributes {stable_mosaic.version = 11 : i64} {
  func.func @_chexbert_fused_kernel(%arg0: i32, %arg1: memref<16x32xf32, #tpu.memory_space<vmem>>, %arg2: memref<1x32xf32, #tpu.memory_space<vmem>>, %arg3: memref<1x32xf32, #tpu.memory_space<vmem>>, %arg4: memref<2x8xf32, #tpu.memory_space<vmem>>, %arg5: memref<1x32x96xf32, #tpu.memory_space<vmem>>, %arg6: memref<1x1x96xf32, #tpu.memory_space<vmem>>, %arg7: memref<1x32x32xf32, #tpu.memory_space<vmem>>, %arg8: memref<1x1x32xf32, #tpu.memory_space<vmem>>, %arg9: memref<1x1x32xf32, #tpu.memory_space<vmem>>, %arg10: memref<1x1x32xf32, #tpu.memory_space<vmem>>, %arg11: memref<1x32x64xf32, #tpu.memory_space<vmem>>, %arg12: memref<1x1x64xf32, #tpu.memory_space<vmem>>, %arg13: memref<1x64x32xf32, #tpu.memory_space<vmem>>, %arg14: memref<1x1x32xf32, #tpu.memory_space<vmem>>, %arg15: memref<1x1x32xf32, #tpu.memory_space<vmem>>, %arg16: memref<1x1x32xf32, #tpu.memory_space<vmem>>, %arg17: memref<32x32xf32, #tpu.memory_space<vmem>>, %arg18: memref<1x32xf32, #tpu.memory_space<vmem>>, %arg19: memref<2x32xf32, #tpu.memory_space<vmem>>, %arg20: memref<16x32xf32, #tpu.memory_space<vmem>>) attributes {dimension_semantics = [#tpu.dimension_semantics<arbitrary>], iteration_bounds = array<i64: 2>, scalar_prefetch = 0 : i64, scratch_operands = 1 : i64, tpu.core_type = #tpu.core_type<tc>, window_params = [{pipeline_mode = #tpu.pipeline_mode<synchronous>, transform_indices = @transform_0, window_bounds = array<i64: 16, 32>}, {pipeline_mode = #tpu.pipeline_mode<synchronous>, transform_indices = @transform_1, window_bounds = array<i64: 1, 32>}, {pipeline_mode = #tpu.pipeline_mode<synchronous>, transform_indices = @transform_2, window_bounds = array<i64: 1, 32>}, {pipeline_mode = #tpu.pipeline_mode<synchronous>, transform_indices = @transform_3, window_bounds = array<i64: 2, 8>}, {transform_indices = @transform_4, window_bounds = array<i64: 1, 32, 96>}, {transform_indices = @transform_5, window_bounds = array<i64: 1, 1, 96>}, {transform_indices = @transform_6, window_bounds = array<i64: 1, 32, 32>}, {transform_indices = @transform_7, window_bounds = array<i64: 1, 1, 32>}, {transform_indices = @transform_8, window_bounds = array<i64: 1, 1, 32>}, {transform_indices = @transform_9, window_bounds = array<i64: 1, 1, 32>}, {transform_indices = @transform_10, window_bounds = array<i64: 1, 32, 64>}, {transform_indices = @transform_11, window_bounds = array<i64: 1, 1, 64>}, {transform_indices = @transform_12, window_bounds = array<i64: 1, 64, 32>}, {transform_indices = @transform_13, window_bounds = array<i64: 1, 1, 32>}, {transform_indices = @transform_14, window_bounds = array<i64: 1, 1, 32>}, {transform_indices = @transform_15, window_bounds = array<i64: 1, 1, 32>}, {pipeline_mode = #tpu.pipeline_mode<synchronous>, transform_indices = @transform_16, window_bounds = array<i64: 32, 32>}, {pipeline_mode = #tpu.pipeline_mode<synchronous>, transform_indices = @transform_17, window_bounds = array<i64: 1, 32>}, {pipeline_mode = #tpu.pipeline_mode<synchronous>, transform_indices = @transform_18, window_bounds = array<i64: 2, 32>}]} {
    %c0_i32 = arith.constant 0 : i32
    %0 = arith.cmpi eq, %arg0, %c0_i32 : i32
    %1 = arith.extui %0 : i1 to i32
    %c0_i32_0 = arith.constant 0 : i32
    %2 = arith.cmpi ne, %1, %c0_i32_0 : i32
    scf.if %2 {
      %c0_82 = arith.constant 0 : index
      %c0_83 = arith.constant 0 : index
      %192 = vector.load %arg1[%c0_82, %c0_83] : memref<16x32xf32, #tpu.memory_space<vmem>>, vector<16x32xf32>
      %c0_84 = arith.constant 0 : index
      %c0_85 = arith.constant 0 : index
      %193 = vector.load %arg2[%c0_84, %c0_85] : memref<1x32xf32, #tpu.memory_space<vmem>>, vector<1x32xf32>
      %c0_86 = arith.constant 0 : index
      %c0_87 = arith.constant 0 : index
      %194 = vector.load %arg3[%c0_86, %c0_87] : memref<1x32xf32, #tpu.memory_space<vmem>>, vector<1x32xf32>
      %cst_88 = arith.constant dense<0.000000e+00> : vector<16xf32>
      %195 = vector.multi_reduction <add>, %192, %cst_88 [1] : vector<16x32xf32> to vector<16xf32>
      %196 = vector.shape_cast %195 : vector<16xf32> to vector<16x1xf32>
      %cst_89 = arith.constant 3.200000e+01 : f32
      %197 = vector.broadcast %cst_89 : f32 to vector<16x1xf32>
      %198 = arith.divf %196, %197 : vector<16x1xf32>
      %199 = vector.broadcast %198 : vector<16x1xf32> to vector<16x32xf32>
      %200 = arith.subf %192, %199 : vector<16x32xf32>
      %201 = vector.broadcast %198 : vector<16x1xf32> to vector<16x32xf32>
      %202 = arith.subf %192, %201 : vector<16x32xf32>
      %203 = arith.mulf %200, %202 : vector<16x32xf32>
      %cst_90 = arith.constant dense<0.000000e+00> : vector<16xf32>
      %204 = vector.multi_reduction <add>, %203, %cst_90 [1] : vector<16x32xf32> to vector<16xf32>
      %205 = vector.shape_cast %204 : vector<16xf32> to vector<16x1xf32>
      %cst_91 = arith.constant 3.200000e+01 : f32
      %206 = vector.broadcast %cst_91 : f32 to vector<16x1xf32>
      %207 = arith.divf %205, %206 : vector<16x1xf32>
      %208 = vector.broadcast %198 : vector<16x1xf32> to vector<16x32xf32>
      %209 = arith.subf %192, %208 : vector<16x32xf32>
      %cst_92 = arith.constant 9.99999996E-13 : f32
      %210 = vector.broadcast %cst_92 : f32 to vector<16x1xf32>
      %211 = arith.addf %207, %210 : vector<16x1xf32>
      %212 = math.rsqrt %211 : vector<16x1xf32>
      %213 = vector.broadcast %212 : vector<16x1xf32> to vector<16x32xf32>
      %214 = arith.mulf %209, %213 : vector<16x32xf32>
      %215 = vector.broadcast %193 : vector<1x32xf32> to vector<16x32xf32>
      %216 = arith.mulf %214, %215 : vector<16x32xf32>
      %217 = vector.broadcast %194 : vector<1x32xf32> to vector<16x32xf32>
      %218 = arith.addf %216, %217 : vector<16x32xf32>
      %c0_93 = arith.constant 0 : index
      %c0_94 = arith.constant 0 : index
      %219 = vector.load %arg20[%c0_93, %c0_94] : memref<16x32xf32, #tpu.memory_space<vmem>>, vector<16x32xf32>
      tpu.vector_store %arg20[%c0_93, %c0_94], %218 {strides = array<i32>} : memref<16x32xf32, #tpu.memory_space<vmem>>, vector<16x32xf32>,
    } else {
    }
    %c0 = arith.constant 0 : index
    %c0_1 = arith.constant 0 : index
    %3 = vector.load %arg20[%c0, %c0_1] : memref<16x32xf32, #tpu.memory_space<vmem>>, vector<16x32xf32>
    %c0_2 = arith.constant 0 : index
    %c0_3 = arith.constant 0 : index
    %c0_4 = arith.constant 0 : index
    %4 = vector.load %arg5[%c0_2, %c0_3, %c0_4] : memref<1x32x96xf32, #tpu.memory_space<vmem>>, vector<1x32x96xf32>
    %5 = vector.shape_cast %4 : vector<1x32x96xf32> to vector<32x96xf32>
    %cst = arith.constant dense<0.000000e+00> : vector<16x96xf32>
    %6 = tpu.matmul %3, %5, %cst {dimension_numbers = #tpu.dot_dimension_numbers<[1], [0], [0], [1], [0, 0, 1, 1], [], []>} : vector<16x32xf32>, vector<32x96xf32>, vector<16x96xf32> -> vector<16x96xf32>
    %c0_5 = arith.constant 0 : index
    %c0_6 = arith.constant 0 : index
    %c0_7 = arith.constant 0 : index
    %7 = vector.load %arg6[%c0_5, %c0_6, %c0_7] : memref<1x1x96xf32, #tpu.memory_space<vmem>>, vector<1x1x96xf32>
    %8 = vector.shape_cast %7 : vector<1x1x96xf32> to vector<1x96xf32>
    %9 = vector.broadcast %8 : vector<1x96xf32> to vector<16x96xf32>
    %10 = arith.addf %6, %9 : vector<16x96xf32>
    %11 = vector.shape_cast %10 : vector<16x96xf32> to vector<2x8x96xf32>
    %c0_8 = arith.constant 0 : index
    %c0_9 = arith.constant 0 : index
    %12 = vector.load %arg4[%c0_8, %c0_9] : memref<2x8xf32, #tpu.memory_space<vmem>>, vector<2x8xf32>
    %cst_10 = arith.constant 1.000000e+00 : f32
    %13 = vector.broadcast %cst_10 : f32 to vector<2x8xf32>
    %14 = arith.subf %13, %12 : vector<2x8xf32>
    %cst_11 = arith.constant -1.000000e+09 : f32
    %15 = vector.broadcast %cst_11 : f32 to vector<2x8xf32>
    %16 = arith.mulf %14, %15 : vector<2x8xf32>
    %17 = vector.shape_cast %16 : vector<2x8xf32> to vector<2x1x8xf32>
    %18 = vector.extract_strided_slice %11 {offsets = [0, 0, 0], sizes = [2, 8, 8], strides = [1, 1, 1]} : vector<2x8x96xf32> to vector<2x8x8xf32>
    %19 = vector.extract_strided_slice %11 {offsets = [0, 0, 32], sizes = [2, 8, 8], strides = [1, 1, 1]} : vector<2x8x96xf32> to vector<2x8x8xf32>
    %20 = vector.extract_strided_slice %11 {offsets = [0, 0, 64], sizes = [2, 8, 8], strides = [1, 1, 1]} : vector<2x8x96xf32> to vector<2x8x8xf32>
    "tpu.trace_start"() <{level = 10 : i32, message = "bqd,bkd->bqk"}> : () -> ()
    %cst_12 = arith.constant dense<0.000000e+00> : vector<2x8x8xf32>
    %21 = tpu.matmul %18, %19, %cst_12 {dimension_numbers = #tpu.dot_dimension_numbers<[2], [2], [1], [1], [0, 0, 0, 1, 1, 1], [0], [0]>} : vector<2x8x8xf32>, vector<2x8x8xf32>, vector<2x8x8xf32> -> vector<2x8x8xf32>
    "tpu.trace_stop"() : () -> ()
    %cst_13 = arith.constant 0.353553385 : f32
    %22 = vector.broadcast %cst_13 : f32 to vector<2x8x8xf32>
    %23 = arith.mulf %21, %22 : vector<2x8x8xf32>
    %24 = vector.broadcast %17 : vector<2x1x8xf32> to vector<2x8x8xf32>
    %25 = arith.addf %23, %24 : vector<2x8x8xf32>
    %cst_14 = arith.constant dense<0xFF800000> : vector<2x8xf32>
    %26 = vector.multi_reduction <maximumf>, %25, %cst_14 [2] : vector<2x8x8xf32> to vector<2x8xf32>
    %27 = vector.shape_cast %26 : vector<2x8xf32> to vector<2x8x1xf32>
    %28 = vector.broadcast %27 : vector<2x8x1xf32> to vector<2x8x8xf32>
    %29 = arith.subf %25, %28 : vector<2x8x8xf32>
    %30 = math.exp %29 : vector<2x8x8xf32>
    %cst_15 = arith.constant dense<0.000000e+00> : vector<2x8xf32>
    %31 = vector.multi_reduction <add>, %30, %cst_15 [2] : vector<2x8x8xf32> to vector<2x8xf32>
    %32 = vector.shape_cast %31 : vector<2x8xf32> to vector<2x8x1xf32>
    %33 = tpu.reciprocal %32 {approx = true} : vector<2x8x1xf32> -> vector<2x8x1xf32>
    %34 = vector.broadcast %33 : vector<2x8x1xf32> to vector<2x8x8xf32>
    %35 = arith.mulf %30, %34 : vector<2x8x8xf32>
    "tpu.trace_start"() <{level = 10 : i32, message = "bqk,bkd->bqd"}> : () -> ()
    %cst_16 = arith.constant dense<0.000000e+00> : vector<2x8x8xf32>
    %36 = tpu.matmul %35, %20, %cst_16 {dimension_numbers = #tpu.dot_dimension_numbers<[2], [1], [1], [2], [0, 0, 0, 1, 1, 2], [0], [0]>} : vector<2x8x8xf32>, vector<2x8x8xf32>, vector<2x8x8xf32> -> vector<2x8x8xf32>
    "tpu.trace_stop"() : () -> ()
    %37 = vector.extract_strided_slice %11 {offsets = [0, 0, 8], sizes = [2, 8, 8], strides = [1, 1, 1]} : vector<2x8x96xf32> to vector<2x8x8xf32>
    %38 = vector.extract_strided_slice %11 {offsets = [0, 0, 40], sizes = [2, 8, 8], strides = [1, 1, 1]} : vector<2x8x96xf32> to vector<2x8x8xf32>
    %39 = vector.extract_strided_slice %11 {offsets = [0, 0, 72], sizes = [2, 8, 8], strides = [1, 1, 1]} : vector<2x8x96xf32> to vector<2x8x8xf32>
    "tpu.trace_start"() <{level = 10 : i32, message = "bqd,bkd->bqk"}> : () -> ()
    %cst_17 = arith.constant dense<0.000000e+00> : vector<2x8x8xf32>
    %40 = tpu.matmul %37, %38, %cst_17 {dimension_numbers = #tpu.dot_dimension_numbers<[2], [2], [1], [1], [0, 0, 0, 1, 1, 1], [0], [0]>} : vector<2x8x8xf32>, vector<2x8x8xf32>, vector<2x8x8xf32> -> vector<2x8x8xf32>
    "tpu.trace_stop"() : () -> ()
    %cst_18 = arith.constant 0.353553385 : f32
    %41 = vector.broadcast %cst_18 : f32 to vector<2x8x8xf32>
    %42 = arith.mulf %40, %41 : vector<2x8x8xf32>
    %43 = vector.broadcast %17 : vector<2x1x8xf32> to vector<2x8x8xf32>
    %44 = arith.addf %42, %43 : vector<2x8x8xf32>
    %cst_19 = arith.constant dense<0xFF800000> : vector<2x8xf32>
    %45 = vector.multi_reduction <maximumf>, %44, %cst_19 [2] : vector<2x8x8xf32> to vector<2x8xf32>
    %46 = vector.shape_cast %45 : vector<2x8xf32> to vector<2x8x1xf32>
    %47 = vector.broadcast %46 : vector<2x8x1xf32> to vector<2x8x8xf32>
    %48 = arith.subf %44, %47 : vector<2x8x8xf32>
    %49 = math.exp %48 : vector<2x8x8xf32>
    %cst_20 = arith.constant dense<0.000000e+00> : vector<2x8xf32>
    %50 = vector.multi_reduction <add>, %49, %cst_20 [2] : vector<2x8x8xf32> to vector<2x8xf32>
    %51 = vector.shape_cast %50 : vector<2x8xf32> to vector<2x8x1xf32>
    %52 = tpu.reciprocal %51 {approx = true} : vector<2x8x1xf32> -> vector<2x8x1xf32>
    %53 = vector.broadcast %52 : vector<2x8x1xf32> to vector<2x8x8xf32>
    %54 = arith.mulf %49, %53 : vector<2x8x8xf32>
    "tpu.trace_start"() <{level = 10 : i32, message = "bqk,bkd->bqd"}> : () -> ()
    %cst_21 = arith.constant dense<0.000000e+00> : vector<2x8x8xf32>
    %55 = tpu.matmul %54, %39, %cst_21 {dimension_numbers = #tpu.dot_dimension_numbers<[2], [1], [1], [2], [0, 0, 0, 1, 1, 2], [0], [0]>} : vector<2x8x8xf32>, vector<2x8x8xf32>, vector<2x8x8xf32> -> vector<2x8x8xf32>
    "tpu.trace_stop"() : () -> ()
    %56 = vector.extract_strided_slice %11 {offsets = [0, 0, 16], sizes = [2, 8, 8], strides = [1, 1, 1]} : vector<2x8x96xf32> to vector<2x8x8xf32>
    %57 = vector.extract_strided_slice %11 {offsets = [0, 0, 48], sizes = [2, 8, 8], strides = [1, 1, 1]} : vector<2x8x96xf32> to vector<2x8x8xf32>
    %58 = vector.extract_strided_slice %11 {offsets = [0, 0, 80], sizes = [2, 8, 8], strides = [1, 1, 1]} : vector<2x8x96xf32> to vector<2x8x8xf32>
    "tpu.trace_start"() <{level = 10 : i32, message = "bqd,bkd->bqk"}> : () -> ()
    %cst_22 = arith.constant dense<0.000000e+00> : vector<2x8x8xf32>
    %59 = tpu.matmul %56, %57, %cst_22 {dimension_numbers = #tpu.dot_dimension_numbers<[2], [2], [1], [1], [0, 0, 0, 1, 1, 1], [0], [0]>} : vector<2x8x8xf32>, vector<2x8x8xf32>, vector<2x8x8xf32> -> vector<2x8x8xf32>
    "tpu.trace_stop"() : () -> ()
    %cst_23 = arith.constant 0.353553385 : f32
    %60 = vector.broadcast %cst_23 : f32 to vector<2x8x8xf32>
    %61 = arith.mulf %59, %60 : vector<2x8x8xf32>
    %62 = vector.broadcast %17 : vector<2x1x8xf32> to vector<2x8x8xf32>
    %63 = arith.addf %61, %62 : vector<2x8x8xf32>
    %cst_24 = arith.constant dense<0xFF800000> : vector<2x8xf32>
    %64 = vector.multi_reduction <maximumf>, %63, %cst_24 [2] : vector<2x8x8xf32> to vector<2x8xf32>
    %65 = vector.shape_cast %64 : vector<2x8xf32> to vector<2x8x1xf32>
    %66 = vector.broadcast %65 : vector<2x8x1xf32> to vector<2x8x8xf32>
    %67 = arith.subf %63, %66 : vector<2x8x8xf32>
    %68 = math.exp %67 : vector<2x8x8xf32>
    %cst_25 = arith.constant dense<0.000000e+00> : vector<2x8xf32>
    %69 = vector.multi_reduction <add>, %68, %cst_25 [2] : vector<2x8x8xf32> to vector<2x8xf32>
    %70 = vector.shape_cast %69 : vector<2x8xf32> to vector<2x8x1xf32>
    %71 = tpu.reciprocal %70 {approx = true} : vector<2x8x1xf32> -> vector<2x8x1xf32>
    %72 = vector.broadcast %71 : vector<2x8x1xf32> to vector<2x8x8xf32>
    %73 = arith.mulf %68, %72 : vector<2x8x8xf32>
    "tpu.trace_start"() <{level = 10 : i32, message = "bqk,bkd->bqd"}> : () -> ()
    %cst_26 = arith.constant dense<0.000000e+00> : vector<2x8x8xf32>
    %74 = tpu.matmul %73, %58, %cst_26 {dimension_numbers = #tpu.dot_dimension_numbers<[2], [1], [1], [2], [0, 0, 0, 1, 1, 2], [0], [0]>} : vector<2x8x8xf32>, vector<2x8x8xf32>, vector<2x8x8xf32> -> vector<2x8x8xf32>
    "tpu.trace_stop"() : () -> ()
    %75 = vector.extract_strided_slice %11 {offsets = [0, 0, 24], sizes = [2, 8, 8], strides = [1, 1, 1]} : vector<2x8x96xf32> to vector<2x8x8xf32>
    %76 = vector.extract_strided_slice %11 {offsets = [0, 0, 56], sizes = [2, 8, 8], strides = [1, 1, 1]} : vector<2x8x96xf32> to vector<2x8x8xf32>
    %77 = vector.extract_strided_slice %11 {offsets = [0, 0, 88], sizes = [2, 8, 8], strides = [1, 1, 1]} : vector<2x8x96xf32> to vector<2x8x8xf32>
    "tpu.trace_start"() <{level = 10 : i32, message = "bqd,bkd->bqk"}> : () -> ()
    %cst_27 = arith.constant dense<0.000000e+00> : vector<2x8x8xf32>
    %78 = tpu.matmul %75, %76, %cst_27 {dimension_numbers = #tpu.dot_dimension_numbers<[2], [2], [1], [1], [0, 0, 0, 1, 1, 1], [0], [0]>} : vector<2x8x8xf32>, vector<2x8x8xf32>, vector<2x8x8xf32> -> vector<2x8x8xf32>
    "tpu.trace_stop"() : () -> ()
    %cst_28 = arith.constant 0.353553385 : f32
    %79 = vector.broadcast %cst_28 : f32 to vector<2x8x8xf32>
    %80 = arith.mulf %78, %79 : vector<2x8x8xf32>
    %81 = vector.broadcast %17 : vector<2x1x8xf32> to vector<2x8x8xf32>
    %82 = arith.addf %80, %81 : vector<2x8x8xf32>
    %cst_29 = arith.constant dense<0xFF800000> : vector<2x8xf32>
    %83 = vector.multi_reduction <maximumf>, %82, %cst_29 [2] : vector<2x8x8xf32> to vector<2x8xf32>
    %84 = vector.shape_cast %83 : vector<2x8xf32> to vector<2x8x1xf32>
    %85 = vector.broadcast %84 : vector<2x8x1xf32> to vector<2x8x8xf32>
    %86 = arith.subf %82, %85 : vector<2x8x8xf32>
    %87 = math.exp %86 : vector<2x8x8xf32>
    %cst_30 = arith.constant dense<0.000000e+00> : vector<2x8xf32>
    %88 = vector.multi_reduction <add>, %87, %cst_30 [2] : vector<2x8x8xf32> to vector<2x8xf32>
    %89 = vector.shape_cast %88 : vector<2x8xf32> to vector<2x8x1xf32>
    %90 = tpu.reciprocal %89 {approx = true} : vector<2x8x1xf32> -> vector<2x8x1xf32>
    %91 = vector.broadcast %90 : vector<2x8x1xf32> to vector<2x8x8xf32>
    %92 = arith.mulf %87, %91 : vector<2x8x8xf32>
    "tpu.trace_start"() <{level = 10 : i32, message = "bqk,bkd->bqd"}> : () -> ()
    %cst_31 = arith.constant dense<0.000000e+00> : vector<2x8x8xf32>
    %93 = tpu.matmul %92, %77, %cst_31 {dimension_numbers = #tpu.dot_dimension_numbers<[2], [1], [1], [2], [0, 0, 0, 1, 1, 2], [0], [0]>} : vector<2x8x8xf32>, vector<2x8x8xf32>, vector<2x8x8xf32> -> vector<2x8x8xf32>
    "tpu.trace_stop"() : () -> ()
    %94 = tpu.concatenate %36, %55, %74, %93 in 2 : vector<2x8x8xf32>, vector<2x8x8xf32>, vector<2x8x8xf32>, vector<2x8x8xf32> -> vector<2x8x32xf32>
    %95 = vector.shape_cast %94 : vector<2x8x32xf32> to vector<16x32xf32>
    %c0_32 = arith.constant 0 : index
    %c0_33 = arith.constant 0 : index
    %c0_34 = arith.constant 0 : index
    %96 = vector.load %arg7[%c0_32, %c0_33, %c0_34] : memref<1x32x32xf32, #tpu.memory_space<vmem>>, vector<1x32x32xf32>
    %97 = vector.shape_cast %96 : vector<1x32x32xf32> to vector<32x32xf32>
    %cst_35 = arith.constant dense<0.000000e+00> : vector<16x32xf32>
    %98 = tpu.matmul %95, %97, %cst_35 {dimension_numbers = #tpu.dot_dimension_numbers<[1], [0], [0], [1], [0, 0, 1, 1], [], []>} : vector<16x32xf32>, vector<32x32xf32>, vector<16x32xf32> -> vector<16x32xf32>
    %c0_36 = arith.constant 0 : index
    %c0_37 = arith.constant 0 : index
    %c0_38 = arith.constant 0 : index
    %99 = vector.load %arg8[%c0_36, %c0_37, %c0_38] : memref<1x1x32xf32, #tpu.memory_space<vmem>>, vector<1x1x32xf32>
    %100 = vector.shape_cast %99 : vector<1x1x32xf32> to vector<1x32xf32>
    %101 = vector.broadcast %100 : vector<1x32xf32> to vector<16x32xf32>
    %102 = arith.addf %98, %101 : vector<16x32xf32>
    %103 = arith.addf %102, %3 : vector<16x32xf32>
    %c0_39 = arith.constant 0 : index
    %c0_40 = arith.constant 0 : index
    %c0_41 = arith.constant 0 : index
    %104 = vector.load %arg9[%c0_39, %c0_40, %c0_41] : memref<1x1x32xf32, #tpu.memory_space<vmem>>, vector<1x1x32xf32>
    %105 = vector.shape_cast %104 : vector<1x1x32xf32> to vector<1x32xf32>
    %c0_42 = arith.constant 0 : index
    %c0_43 = arith.constant 0 : index
    %c0_44 = arith.constant 0 : index
    %106 = vector.load %arg10[%c0_42, %c0_43, %c0_44] : memref<1x1x32xf32, #tpu.memory_space<vmem>>, vector<1x1x32xf32>
    %107 = vector.shape_cast %106 : vector<1x1x32xf32> to vector<1x32xf32>
    %cst_45 = arith.constant dense<0.000000e+00> : vector<16xf32>
    %108 = vector.multi_reduction <add>, %103, %cst_45 [1] : vector<16x32xf32> to vector<16xf32>
    %109 = vector.shape_cast %108 : vector<16xf32> to vector<16x1xf32>
    %cst_46 = arith.constant 3.200000e+01 : f32
    %110 = vector.broadcast %cst_46 : f32 to vector<16x1xf32>
    %111 = arith.divf %109, %110 : vector<16x1xf32>
    %112 = vector.broadcast %111 : vector<16x1xf32> to vector<16x32xf32>
    %113 = arith.subf %103, %112 : vector<16x32xf32>
    %114 = vector.broadcast %111 : vector<16x1xf32> to vector<16x32xf32>
    %115 = arith.subf %103, %114 : vector<16x32xf32>
    %116 = arith.mulf %113, %115 : vector<16x32xf32>
    %cst_47 = arith.constant dense<0.000000e+00> : vector<16xf32>
    %117 = vector.multi_reduction <add>, %116, %cst_47 [1] : vector<16x32xf32> to vector<16xf32>
    %118 = vector.shape_cast %117 : vector<16xf32> to vector<16x1xf32>
    %cst_48 = arith.constant 3.200000e+01 : f32
    %119 = vector.broadcast %cst_48 : f32 to vector<16x1xf32>
    %120 = arith.divf %118, %119 : vector<16x1xf32>
    %121 = vector.broadcast %111 : vector<16x1xf32> to vector<16x32xf32>
    %122 = arith.subf %103, %121 : vector<16x32xf32>
    %cst_49 = arith.constant 9.99999996E-13 : f32
    %123 = vector.broadcast %cst_49 : f32 to vector<16x1xf32>
    %124 = arith.addf %120, %123 : vector<16x1xf32>
    %125 = math.rsqrt %124 : vector<16x1xf32>
    %126 = vector.broadcast %125 : vector<16x1xf32> to vector<16x32xf32>
    %127 = arith.mulf %122, %126 : vector<16x32xf32>
    %128 = vector.broadcast %105 : vector<1x32xf32> to vector<16x32xf32>
    %129 = arith.mulf %127, %128 : vector<16x32xf32>
    %130 = vector.broadcast %107 : vector<1x32xf32> to vector<16x32xf32>
    %131 = arith.addf %129, %130 : vector<16x32xf32>
    %c0_50 = arith.constant 0 : index
    %c0_51 = arith.constant 0 : index
    %c0_52 = arith.constant 0 : index
    %132 = vector.load %arg11[%c0_50, %c0_51, %c0_52] : memref<1x32x64xf32, #tpu.memory_space<vmem>>, vector<1x32x64xf32>
    %133 = vector.shape_cast %132 : vector<1x32x64xf32> to vector<32x64xf32>
    %cst_53 = arith.constant dense<0.000000e+00> : vector<16x64xf32>
    %134 = tpu.matmul %131, %133, %cst_53 {dimension_numbers = #tpu.dot_dimension_numbers<[1], [0], [0], [1], [0, 0, 1, 1], [], []>} : vector<16x32xf32>, vector<32x64xf32>, vector<16x64xf32> -> vector<16x64xf32>
    %c0_54 = arith.constant 0 : index
    %c0_55 = arith.constant 0 : index
    %c0_56 = arith.constant 0 : index
    %135 = vector.load %arg12[%c0_54, %c0_55, %c0_56] : memref<1x1x64xf32, #tpu.memory_space<vmem>>, vector<1x1x64xf32>
    %136 = vector.shape_cast %135 : vector<1x1x64xf32> to vector<1x64xf32>
    %137 = vector.broadcast %136 : vector<1x64xf32> to vector<16x64xf32>
    %138 = arith.addf %134, %137 : vector<16x64xf32>
    %139 = arith.mulf %138, %138 : vector<16x64xf32>
    %140 = arith.mulf %138, %139 : vector<16x64xf32>
    %cst_57 = arith.constant 4.471500e-02 : f32
    %141 = vector.broadcast %cst_57 : f32 to vector<16x64xf32>
    %142 = arith.mulf %141, %140 : vector<16x64xf32>
    %143 = arith.addf %138, %142 : vector<16x64xf32>
    %cst_58 = arith.constant 0.797884583 : f32
    %144 = vector.broadcast %cst_58 : f32 to vector<16x64xf32>
    %145 = arith.mulf %144, %143 : vector<16x64xf32>
    %146 = math.tanh %145 : vector<16x64xf32>
    %cst_59 = arith.constant 1.000000e+00 : f32
    %147 = vector.broadcast %cst_59 : f32 to vector<16x64xf32>
    %148 = arith.addf %147, %146 : vector<16x64xf32>
    %cst_60 = arith.constant 5.000000e-01 : f32
    %149 = vector.broadcast %cst_60 : f32 to vector<16x64xf32>
    %150 = arith.mulf %149, %148 : vector<16x64xf32>
    %151 = arith.mulf %138, %150 : vector<16x64xf32>
    %c0_61 = arith.constant 0 : index
    %c0_62 = arith.constant 0 : index
    %c0_63 = arith.constant 0 : index
    %152 = vector.load %arg13[%c0_61, %c0_62, %c0_63] : memref<1x64x32xf32, #tpu.memory_space<vmem>>, vector<1x64x32xf32>
    %153 = vector.shape_cast %152 : vector<1x64x32xf32> to vector<64x32xf32>
    %cst_64 = arith.constant dense<0.000000e+00> : vector<16x32xf32>
    %154 = tpu.matmul %151, %153, %cst_64 {dimension_numbers = #tpu.dot_dimension_numbers<[1], [0], [0], [1], [0, 0, 1, 1], [], []>} : vector<16x64xf32>, vector<64x32xf32>, vector<16x32xf32> -> vector<16x32xf32>
    %c0_65 = arith.constant 0 : index
    %c0_66 = arith.constant 0 : index
    %c0_67 = arith.constant 0 : index
    %155 = vector.load %arg14[%c0_65, %c0_66, %c0_67] : memref<1x1x32xf32, #tpu.memory_space<vmem>>, vector<1x1x32xf32>
    %156 = vector.shape_cast %155 : vector<1x1x32xf32> to vector<1x32xf32>
    %157 = vector.broadcast %156 : vector<1x32xf32> to vector<16x32xf32>
    %158 = arith.addf %154, %157 : vector<16x32xf32>
    %159 = arith.addf %158, %131 : vector<16x32xf32>
    %c0_68 = arith.constant 0 : index
    %c0_69 = arith.constant 0 : index
    %c0_70 = arith.constant 0 : index
    %160 = vector.load %arg15[%c0_68, %c0_69, %c0_70] : memref<1x1x32xf32, #tpu.memory_space<vmem>>, vector<1x1x32xf32>
    %161 = vector.shape_cast %160 : vector<1x1x32xf32> to vector<1x32xf32>
    %c0_71 = arith.constant 0 : index
    %c0_72 = arith.constant 0 : index
    %c0_73 = arith.constant 0 : index
    %162 = vector.load %arg16[%c0_71, %c0_72, %c0_73] : memref<1x1x32xf32, #tpu.memory_space<vmem>>, vector<1x1x32xf32>
    %163 = vector.shape_cast %162 : vector<1x1x32xf32> to vector<1x32xf32>
    %cst_74 = arith.constant dense<0.000000e+00> : vector<16xf32>
    %164 = vector.multi_reduction <add>, %159, %cst_74 [1] : vector<16x32xf32> to vector<16xf32>
    %165 = vector.shape_cast %164 : vector<16xf32> to vector<16x1xf32>
    %cst_75 = arith.constant 3.200000e+01 : f32
    %166 = vector.broadcast %cst_75 : f32 to vector<16x1xf32>
    %167 = arith.divf %165, %166 : vector<16x1xf32>
    %168 = vector.broadcast %167 : vector<16x1xf32> to vector<16x32xf32>
    %169 = arith.subf %159, %168 : vector<16x32xf32>
    %170 = vector.broadcast %167 : vector<16x1xf32> to vector<16x32xf32>
    %171 = arith.subf %159, %170 : vector<16x32xf32>
    %172 = arith.mulf %169, %171 : vector<16x32xf32>
    %cst_76 = arith.constant dense<0.000000e+00> : vector<16xf32>
    %173 = vector.multi_reduction <add>, %172, %cst_76 [1] : vector<16x32xf32> to vector<16xf32>
    %174 = vector.shape_cast %173 : vector<16xf32> to vector<16x1xf32>
    %cst_77 = arith.constant 3.200000e+01 : f32
    %175 = vector.broadcast %cst_77 : f32 to vector<16x1xf32>
    %176 = arith.divf %174, %175 : vector<16x1xf32>
    %177 = vector.broadcast %167 : vector<16x1xf32> to vector<16x32xf32>
    %178 = arith.subf %159, %177 : vector<16x32xf32>
    %cst_78 = arith.constant 9.99999996E-13 : f32
    %179 = vector.broadcast %cst_78 : f32 to vector<16x1xf32>
    %180 = arith.addf %176, %179 : vector<16x1xf32>
    %181 = math.rsqrt %180 : vector<16x1xf32>
    %182 = vector.broadcast %181 : vector<16x1xf32> to vector<16x32xf32>
    %183 = arith.mulf %178, %182 : vector<16x32xf32>
    %184 = vector.broadcast %161 : vector<1x32xf32> to vector<16x32xf32>
    %185 = arith.mulf %183, %184 : vector<16x32xf32>
    %186 = vector.broadcast %163 : vector<1x32xf32> to vector<16x32xf32>
    %187 = arith.addf %185, %186 : vector<16x32xf32>
    %c0_79 = arith.constant 0 : index
    %c0_80 = arith.constant 0 : index
    %188 = vector.load %arg20[%c0_79, %c0_80] : memref<16x32xf32, #tpu.memory_space<vmem>>, vector<16x32xf32>
    tpu.vector_store %arg20[%c0_79, %c0_80], %187 {strides = array<i32>} : memref<16x32xf32, #tpu.memory_space<vmem>>, vector<16x32xf32>,
    %c1_i32 = arith.constant 1 : i32
    %189 = arith.cmpi eq, %arg0, %c1_i32 : i32
    %190 = arith.extui %189 : i1 to i32
    %c0_i32_81 = arith.constant 0 : i32
    %191 = arith.cmpi ne, %190, %c0_i32_81 : i32
    scf.if %191 {
      %192 = vector.extract_strided_slice %187 {offsets = [0, 0], sizes = [1, 32], strides = [1, 1]} : vector<16x32xf32> to vector<1x32xf32>
      %193 = vector.extract_strided_slice %187 {offsets = [8, 0], sizes = [1, 32], strides = [1, 1]} : vector<16x32xf32> to vector<1x32xf32>
      %194 = tpu.concatenate %192, %193 in 0 : vector<1x32xf32>, vector<1x32xf32> -> vector<2x32xf32>
      %c0_82 = arith.constant 0 : index
      %c0_83 = arith.constant 0 : index
      %195 = vector.load %arg17[%c0_82, %c0_83] : memref<32x32xf32, #tpu.memory_space<vmem>>, vector<32x32xf32>
      %cst_84 = arith.constant dense<0.000000e+00> : vector<2x32xf32>
      %196 = tpu.matmul %194, %195, %cst_84 {dimension_numbers = #tpu.dot_dimension_numbers<[1], [0], [0], [1], [0, 0, 1, 1], [], []>} : vector<2x32xf32>, vector<32x32xf32>, vector<2x32xf32> -> vector<2x32xf32>
      %c0_85 = arith.constant 0 : index
      %c0_86 = arith.constant 0 : index
      %197 = vector.load %arg18[%c0_85, %c0_86] : memref<1x32xf32, #tpu.memory_space<vmem>>, vector<1x32xf32>
      %198 = vector.broadcast %197 : vector<1x32xf32> to vector<2x32xf32>
      %199 = arith.addf %196, %198 : vector<2x32xf32>
      %200 = math.tanh %199 : vector<2x32xf32>
      %c0_87 = arith.constant 0 : index
      %c0_88 = arith.constant 0 : index
      %201 = vector.load %arg19[%c0_87, %c0_88] : memref<2x32xf32, #tpu.memory_space<vmem>>, vector<2x32xf32>
      tpu.vector_store %arg19[%c0_87, %c0_88], %200 {strides = array<i32>} : memref<2x32xf32, #tpu.memory_space<vmem>>, vector<2x32xf32>,
    } else {
    }
    return
  }
  func.func @transform_0(%arg0: i32) -> (i32, i32) {
    %c0_i32 = arith.constant 0 : i32
    %c0_i32_0 = arith.constant 0 : i32
    %c0_i32_1 = arith.constant 0 : i32
    return %c0_i32, %c0_i32_0 : i32, i32
  }
  func.func @transform_1(%arg0: i32) -> (i32, i32) {
    %c0_i32 = arith.constant 0 : i32
    %c0_i32_0 = arith.constant 0 : i32
    %c0_i32_1 = arith.constant 0 : i32
    return %c0_i32, %c0_i32_0 : i32, i32
  }
  func.func @transform_2(%arg0: i32) -> (i32, i32) {
    %c0_i32 = arith.constant 0 : i32
    %c0_i32_0 = arith.constant 0 : i32
    %c0_i32_1 = arith.constant 0 : i32
    return %c0_i32, %c0_i32_0 : i32, i32
  }
  func.func @transform_3(%arg0: i32) -> (i32, i32) {
    %c0_i32 = arith.constant 0 : i32
    %c0_i32_0 = arith.constant 0 : i32
    %c0_i32_1 = arith.constant 0 : i32
    return %c0_i32, %c0_i32_0 : i32, i32
  }
  func.func @transform_4(%arg0: i32) -> (i32, i32, i32) {
    %c0_i32 = arith.constant 0 : i32
    %c0_i32_0 = arith.constant 0 : i32
    %c0_i32_1 = arith.constant 0 : i32
    return %arg0, %c0_i32, %c0_i32_0 : i32, i32, i32
  }
  func.func @transform_5(%arg0: i32) -> (i32, i32, i32) {
    %c0_i32 = arith.constant 0 : i32
    %c0_i32_0 = arith.constant 0 : i32
    %c0_i32_1 = arith.constant 0 : i32
    return %arg0, %c0_i32, %c0_i32_0 : i32, i32, i32
  }
  func.func @transform_6(%arg0: i32) -> (i32, i32, i32) {
    %c0_i32 = arith.constant 0 : i32
    %c0_i32_0 = arith.constant 0 : i32
    %c0_i32_1 = arith.constant 0 : i32
    return %arg0, %c0_i32, %c0_i32_0 : i32, i32, i32
  }
  func.func @transform_7(%arg0: i32) -> (i32, i32, i32) {
    %c0_i32 = arith.constant 0 : i32
    %c0_i32_0 = arith.constant 0 : i32
    %c0_i32_1 = arith.constant 0 : i32
    return %arg0, %c0_i32, %c0_i32_0 : i32, i32, i32
  }
  func.func @transform_8(%arg0: i32) -> (i32, i32, i32) {
    %c0_i32 = arith.constant 0 : i32
    %c0_i32_0 = arith.constant 0 : i32
    %c0_i32_1 = arith.constant 0 : i32
    return %arg0, %c0_i32, %c0_i32_0 : i32, i32, i32
  }
  func.func @transform_9(%arg0: i32) -> (i32, i32, i32) {
    %c0_i32 = arith.constant 0 : i32
    %c0_i32_0 = arith.constant 0 : i32
    %c0_i32_1 = arith.constant 0 : i32
    return %arg0, %c0_i32, %c0_i32_0 : i32, i32, i32
  }
  func.func @transform_10(%arg0: i32) -> (i32, i32, i32) {
    %c0_i32 = arith.constant 0 : i32
    %c0_i32_0 = arith.constant 0 : i32
    %c0_i32_1 = arith.constant 0 : i32
    return %arg0, %c0_i32, %c0_i32_0 : i32, i32, i32
  }
  func.func @transform_11(%arg0: i32) -> (i32, i32, i32) {
    %c0_i32 = arith.constant 0 : i32
    %c0_i32_0 = arith.constant 0 : i32
    %c0_i32_1 = arith.constant 0 : i32
    return %arg0, %c0_i32, %c0_i32_0 : i32, i32, i32
  }
  func.func @transform_12(%arg0: i32) -> (i32, i32, i32) {
    %c0_i32 = arith.constant 0 : i32
    %c0_i32_0 = arith.constant 0 : i32
    %c0_i32_1 = arith.constant 0 : i32
    return %arg0, %c0_i32, %c0_i32_0 : i32, i32, i32
  }
  func.func @transform_13(%arg0: i32) -> (i32, i32, i32) {
    %c0_i32 = arith.constant 0 : i32
    %c0_i32_0 = arith.constant 0 : i32
    %c0_i32_1 = arith.constant 0 : i32
    return %arg0, %c0_i32, %c0_i32_0 : i32, i32, i32
  }
  func.func @transform_14(%arg0: i32) -> (i32, i32, i32) {
    %c0_i32 = arith.constant 0 : i32
    %c0_i32_0 = arith.constant 0 : i32
    %c0_i32_1 = arith.constant 0 : i32
    return %arg0, %c0_i32, %c0_i32_0 : i32, i32, i32
  }
  func.func @transform_15(%arg0: i32) -> (i32, i32, i32) {
    %c0_i32 = arith.constant 0 : i32
    %c0_i32_0 = arith.constant 0 : i32
    %c0_i32_1 = arith.constant 0 : i32
    return %arg0, %c0_i32, %c0_i32_0 : i32, i32, i32
  }
  func.func @transform_16(%arg0: i32) -> (i32, i32) {
    %c0_i32 = arith.constant 0 : i32
    %c0_i32_0 = arith.constant 0 : i32
    %c0_i32_1 = arith.constant 0 : i32
    return %c0_i32, %c0_i32_0 : i32, i32
  }
  func.func @transform_17(%arg0: i32) -> (i32, i32) {
    %c0_i32 = arith.constant 0 : i32
    %c0_i32_0 = arith.constant 0 : i32
    %c0_i32_1 = arith.constant 0 : i32
    return %c0_i32, %c0_i32_0 : i32, i32
  }
  func.func @transform_18(%arg0: i32) -> (i32, i32) {
    %c0_i32 = arith.constant 0 : i32
    %c0_i32_0 = arith.constant 0 : i32
    %c0_i32_1 = arith.constant 0 : i32
    return %c0_i32, %c0_i32_0 : i32, i32
  }
}

</mosaic_0001>

<bundles_post_ra>
// kernel: tpu_custom_call.1
= control target key start
LH: loop header
LB: loop body
LE: loop exit
PB: predicated region body
PF: predicated region fallthrough
CT: control target
= control target key end

     0   :  { %s4626_s0 = inlined_call_operand.hbm [shape: f32[16,32], index: 0, kind: input, shape index: {}]   ;;  %s4627_s1 = inlined_call_operand.hbm [shape: f32[1,32], index: 1, kind: input, shape index: {}]   ;;  %s4628_s2 = inlined_call_operand.hbm [shape: f32[1,32], index: 2, kind: input, shape index: {}]   ;;  %s4629_s3 = inlined_call_operand.vmem [shape: f32[2,8], index: 3, kind: input, shape index: {}]   ;;  %s4630_s4 = inlined_call_operand.vmem [shape: f32[2,32,96], index: 4, kind: input, shape index: {}]   ;;  %s4631_s5 = inlined_call_operand.hbm [shape: f32[2,1,96], index: 5, kind: input, shape index: {}]   ;;  %s4632_s6 = inlined_call_operand.vmem [shape: f32[2,32,32], index: 6, kind: input, shape index: {}]   ;;  %s4633_s7 = inlined_call_operand.hbm [shape: f32[2,1,32], index: 7, kind: input, shape index: {}]   ;;  %s4634_s8 = inlined_call_operand.hbm [shape: f32[2,1,32], index: 8, kind: input, shape index: {}]   ;;  %s4635_s9 = inlined_call_operand.hbm [shape: f32[2,1,32], index: 9, kind: input, shape index: {}]   ;;  %s4636_s10 = inlined_call_operand.vmem [shape: f32[2,32,64], index: 10, kind: input, shape index: {}]   ;;  %s4637_s11 = inlined_call_operand.vmem [shape: f32[2,1,64], index: 11, kind: input, shape index: {}]   ;;  %s4638_s12 = inlined_call_operand.vmem [shape: f32[2,64,32], index: 12, kind: input, shape index: {}]   ;;  %s4639_s13 = inlined_call_operand.vmem [shape: f32[2,1,32], index: 13, kind: input, shape index: {}]   ;;  %s4640_s14 = inlined_call_operand.vmem [shape: f32[2,1,32], index: 14, kind: input, shape index: {}]   ;;  %s4641_s15 = inlined_call_operand.vmem [shape: f32[2,1,32], index: 15, kind: input, shape index: {}]   ;;  %s4642_s16 = inlined_call_operand.vmem [shape: f32[32,32], index: 16, kind: input, shape index: {}]   ;;  %s4643_s17 = inlined_call_operand.vmem [shape: f32[1,32], index: 17, kind: input, shape index: {}]   ;;  %s4644_s18 = inlined_call_operand.hbm [shape: f32[2,32], index: 18, kind: output, shape index: {}]  }
   0x1   :  { %4665 = sst [smem:[#allocation24_spill]] %s4626_s0 }
   0x2   :  { %4666 = sst [smem:[#allocation25_spill]] %s4627_s1 }
   0x3   :  { %4667 = sst [smem:[#allocation26_spill]] %s4628_s2 }
   0x4   :  { %4668 = sst [smem:[#allocation27_spill]] %s4629_s3 }
   0x5   :  { %4669 = sst [smem:[#allocation28_spill]] %s4630_s4 }
   0x6   :  { %4670 = sst [smem:[#allocation29_spill]] %s4631_s5 }
   0x7   :  { %4671 = sst [smem:[#allocation30_spill]] %s4632_s6 }
   0x8   :  { %4672 = sst [smem:[#allocation31_spill]] %s4634_s8 }
   0x9   :  { %4673 = sst [smem:[#allocation32_spill]] %s4636_s10 }
   0xa   :  { %4674 = sst [smem:[#allocation33_spill]] %s4637_s11 }
   0xb   :  { %4675 = sst [smem:[#allocation34_spill]] %s4638_s12 }
   0xc   :  { %4676 = sst [smem:[#allocation35_spill]] %s4639_s13 }
   0xd   :  { %4677 = sst [smem:[#allocation36_spill]] %s4640_s14 }
   0xe   :  { %4678 = sst [smem:[#allocation37_spill]] %s4641_s15 }
   0xf   :  { %4679 = sst [smem:[#allocation38_spill]] %s4642_s16 }
  0x10   :  { %4680 = sst [smem:[#allocation39_spill]] %s4643_s17 }
  0x11   :  { %4681 = sst [smem:[#allocation40_spill]] %s4644_s18 }
  0x12   :  { %23 = vsyncpa [#allocation4], 0 }
  0x13   :  { %24 = vsyncpa [#allocation7], 0 }
  0x14   :  { %25 = vsyncpa [#allocation10], 0 }
  0x15   :  { %27 = vsyncpa [#allocation10 + $0x1], 0 }
  0x16   :  { %28 = vsyncpa [#allocation13], 0 }
  0x17   :  { %30 = vsyncpa [#allocation13 + $0x1], 0 }
  0x18   :  { %31 = vsyncpa [#allocation5], 0  ;;  %s4014_s27 = smov 0   ;;  %s4016_s28 = smov 0  }
  0x19   :  { %s4018_s29 = smov 0   ;;  %s4020_s30 = smov 0  }
  0x1a LB: > { %4682 = sst [smem:[#allocation21_spill]] %s3883_s29  ;;  %s4033_s0 = sadd.s32 4294967295, %s3887_s30   ;;  %s3887_s30 = sphi %s4020_s30, %s4733_s30   ;;  %s3883_s29 = sphi %s4018_s29, %s4735_s29   ;;  %s3879_s28 = sphi %s4016_s28, %s4737_s28   ;;  %s3875_s27 = sphi %s4014_s27, %s4736_s27  }
  0x1b   : > { %p167_p0 = scmp.ne.s32.totalorder %s3879_s28, %s3875_s27  ;;  %p4652_p1 = scmp.eq.s32.totalorder %s4033_s0, 0 }
  0x1c   : > { %p3114_p2 = scmp.ge.s32.totalorder %s3887_s30, 1  ;;  %p501_p3 = scmp.lt.s32.totalorder %s3887_s30, 3 }
  0x1d   : > { %p4042_p5 = por %p4652_p1, %p167_p0  ;;  %s3889_s20 = smov [#allocation6]  }
  0x1e   : > { %p4046_p6 = pnand %p3114_p2, %p501_p3  ;;  %s527_s21 = sshll.u32 %s3889_s20, 4  ;;  %s528_s21 = int_to_ptr.vmem [resolvable:$true] %s527_s21 }
  0x1f   : > { %s4683_s19 = scalar_select %p4042_p5, 1, 0 }
  0x20   : > { %s4684_s1 = scalar_select %p4046_p6, 1, 0 }
  0x21   : > { %p3467_p7 = pneg %p4046_p6  ;;  %s4053_s22 = sadd.s32 1, %s3887_s30  }
  0x22   : > { %4685 = sst [smem:[#allocation22_spill]] %s4053_s22  ;;  %s151_s23 = ssub.s32 %s3887_s30, %s4053_s22 }
  0x23   : > { %p4057_p8 = pnand %p3467_p7, %p4652_p1  ;;  %p4063_p9 = scmp.eq.s32.totalorder %s151_s23, 0 }
  0x24   : > { %s154_s25 = sadd.s32 1, %s3883_s29  ;;  %s4688_s20 = sld [smem:[#allocation25_spill]] }
  0x25   : > { %s4686_s2 = scalar_select %p4057_p8, 1, 0 }
  0x26   : > { %s4687_s24 = scalar_select %p4063_p9, 1, 0 }
  0x27   : > { %p4078_p12 = pneg %p4057_p8 }
  0x29   : > { %s4689_s3 = scalar_select %p4078_p12, 1, 0 }
  0x2a   : > { %s3607_s18 = scalar_lea.hbm %s4688_s20, 16 }
  0x2b   : > { %p3608_p11 = scmp.ne.s32.totalorder %s4688_s20, %s3607_s18  ;;  %p3614_p2 = scmp.lt.u32.totalorder %s3607_s18, %s4688_s20 }
  0x2d   : > { %p3610_p13 = pnand %p4078_p12, %p3608_p11 }
  0x2f   : > { %p3611_p0 = pneg %p3610_p13 }
  0x31   : > { %p3616_p3 = pnand %p3614_p2, %p3611_p0 }
  0x33   : > { %3619 = shalt.err (!%p3616_p3)
}
  0x34   : > { %s3620_s26 = scalar_lea.vmem %s528_s21, 16  ;;  %s3627_s16 = scalar_lea.vmem %s528_s21, 32 }
  0x35   : > { %p3621_p7 = scmp.ne.s32.totalorder %s528_s21, %s3620_s26  ;;  %p3628_p10 = scmp.lt.s32.totalorder %s528_s21, %s528_s21 }
  0x36   : > { %p3629_p5 = scmp.lt.s32.totalorder %s3627_s16, %s3620_s26 }
  0x37   : > { %p3623_p4 = pnand %p3621_p7, %p4078_p12 }
  0x38   : > { %p3630_p6 = por %p3629_p5, %p3628_p10 }
  0x39   : > { %p3624_p1 = pneg %p3623_p4 }
  0x3b   : > { %p3631_p9 = pnand %p3630_p6, %p3624_p1 }
  0x3d   : > { %3634 = shalt.err (!%p3631_p9)
}
  0x3e   : > { %3473 = dma.hbm_to_vmem [thread:$0]  (!%p4057_p8), %s4688_s20, 16, %s528_s21, [#allocation7]  }
  0x3f   : > { %p4690_p4 = scmp.ne.s32.totalorder %s4687_s24, 0  ;;  %p162_p1 = scmp.eq.s32.totalorder %s3887_s30, 0 }
  0x40   : > { %p3493_p5 = scmp.lt.s32.totalorder %s3887_s30, 2  ;;  %s4103_s23 = sand.u32 1, %s3883_s29  }
  0x41   : > { %s4097_s18 = scalar_select %p4690_p4, %s3883_s29, %s154_s25  }
  0x42   : > { %p4692_p6 = scmp.ne.s32.totalorder %s3883_s29, %s3879_s28  ;;  %s4109_s26 = sshll.u32 %s3887_s30, 4 }
  0x43   : > { %4691 = sst [smem:[#allocation23_spill]] %s4097_s18  ;;  %s4693_s5 = sld [smem:[#allocation29_spill]] }
  0x44   : > { %p163_p9 = por %p162_p1, %p4692_p6  ;;  %s569_s21 = scalar_lea.vmem [#allocation9], %s4103_s23 }
  0x45   : > { %s576_s24 = sshll.u32 %s569_s21, 4  ;;  %s4695_s8 = sld [smem:[#allocation31_spill]]  ;;  %s4118_s24 = int_to_ptr.vmem [resolvable:$true] %s576_s24 }
  0x46   : > { %p4120_p10 = pnand %p3493_p5, %p163_p9  ;;  %s4696_s17 = sand.u32 1, %s3887_s30  }
  0x47   : > { %s4132_s18 = scalar_lea.sflag [#allocation10], %s4696_s17 }
  0x48   : > { %s4694_s25 = scalar_select %p4120_p10, 1, 0 }
  0x49   : > { %s4115_s27 = scalar_lea.hbm %s4693_s5, %s4109_s26  ;;  %p4138_p13 = pneg %p4120_p10 }
  0x4a   : > { %s3635_s29 = scalar_lea.hbm %s4115_s27, 16  ;;  %s3640_s20 = scalar_lea.hbm %s4693_s5, 32 }
  0x4b   : > { %s4128_s16 = scalar_lea.hbm %s4695_s8, %s4109_s26  ;;  %p3636_p11 = scmp.ne.s32.totalorder %s4115_s27, %s3635_s29 }
  0x4c   : > { %s4697_s21 = scalar_select %p4138_p13, 1, 0 }
  0x4d   : > { %p3638_p0 = pnand %p4138_p13, %p3636_p11  ;;  %p3641_p3 = scmp.lt.u32.totalorder %s4115_s27, %s4693_s5 }
  0x4e   : > { %p3642_p7 = scmp.lt.u32.totalorder %s3640_s20, %s3635_s29  ;;  %p3644_p1 = scmp.lt.u32.totalorder %s3635_s29, %s4115_s27 }
  0x4f   : > { %p3639_p2 = pneg %p3638_p0 }
  0x50   : > { %p3643_p4 = por %p3642_p7, %p3641_p3 }
  0x52   : > { %p3645_p5 = por %p3644_p1, %p3643_p4 }
  0x54   : > { %p3646_p6 = pnand %p3645_p5, %p3639_p2 }
  0x56   : > { %3649 = shalt.err (!%p3646_p6)
}
  0x57   : > { %s3650_s17 = scalar_lea.vmem %s4118_s24, 16  ;;  %s3890_s14 = smov [#allocation9]  }
  0x58   : > { %p3651_p9 = scmp.ne.s32.totalorder %s4118_s24, %s3650_s17  ;;  %s3655_s15 = sshll.u32 %s3890_s14, 4  ;;  %s3656_s15 = int_to_ptr.vmem [resolvable:$false] %s3655_s15 }
  0x59   : > { %s3657_s13 = scalar_lea.vmem %s3656_s15, 32  ;;  %p3658_p8 = scmp.lt.s32.totalorder %s4118_s24, %s3656_s15 }
  0x5a   : > { %p3653_p11 = pnand %p3651_p9, %p4138_p13  ;;  %p3659_p12 = scmp.lt.s32.totalorder %s3657_s13, %s3650_s17 }
  0x5c   : > { %p3654_p0 = pneg %p3653_p11  ;;  %p3660_p3 = por %p3659_p12, %p3658_p8 }
  0x5e   : > { %p3661_p7 = pnand %p3660_p3, %p3654_p0 }
  0x60   : > { %3664 = shalt.err (!%p3661_p7)
}
  0x61   : > { %3480 = dma.hbm_to_vmem [thread:$0]  (!%p4120_p10), %s4115_s27, 16, %s4118_s24, %s4132_s18  }
  0x62   : > { %s611_s29 = scalar_lea.vmem [#allocation12], %s4103_s23  ;;  %s3891_s22 = smov [#allocation3]  }
  0x63   : > { %s618_s20 = sshll.u32 %s611_s29, 4  ;;  %s4165_s17 = sshll.u32 %s3891_s22, 4  ;;  %s4163_s20 = int_to_ptr.vmem [resolvable:$true] %s618_s20  ;;  %s514_s17 = int_to_ptr.vmem [resolvable:$true] %s4165_s17 }
  0x64   : > { %s4698_s14 = sand.u32 1, %s3887_s30   ;;  %s3665_s13 = scalar_lea.hbm %s4128_s16, 16 }
  0x65   : > { %s4169_s15 = scalar_lea.sflag [#allocation13], %s4698_s14  ;;  %p3666_p8 = scmp.ne.s32.totalorder %s4128_s16, %s3665_s13 }
  0x66   : > { %s3670_s10 = scalar_lea.hbm %s4695_s8, 32  ;;  %p3671_p4 = scmp.lt.u32.totalorder %s4128_s16, %s4695_s8 }
  0x67   : > { %p3668_p12 = pnand %p3666_p8, %p4138_p13  ;;  %p3672_p1 = scmp.lt.u32.totalorder %s3670_s10, %s3665_s13 }
  0x68   : > { %p3674_p6 = scmp.lt.u32.totalorder %s3665_s13, %s4128_s16 }
  0x69   : > { %p3669_p2 = pneg %p3668_p12  ;;  %p3673_p5 = por %p3672_p1, %p3671_p4 }
  0x6b   : > { %p3675_p9 = por %p3674_p6, %p3673_p5 }
  0x6d   : > { %p3676_p11 = pnand %p3675_p9, %p3669_p2 }
  0x6f   : > { %3679 = shalt.err (!%p3676_p11)
}
  0x70   : > { %s3680_s30 = scalar_lea.vmem %s4163_s20, 16  ;;  %s3892_s5 = smov [#allocation12]  }
  0x71   : > { %p3681_p0 = scmp.ne.s32.totalorder %s4163_s20, %s3680_s30  ;;  %s3685_s12 = sshll.u32 %s3892_s5, 4  ;;  %s3686_s12 = int_to_ptr.vmem [resolvable:$false] %s3685_s12 }
  0x72   : > { %s3687_s29 = scalar_lea.vmem %s3686_s12, 32  ;;  %p3688_p8 = scmp.lt.s32.totalorder %s4163_s20, %s3686_s12 }
  0x73   : > { %p3683_p3 = pnand %p3681_p0, %p4138_p13  ;;  %p3689_p12 = scmp.lt.s32.totalorder %s3687_s29, %s3680_s30 }
  0x75   : > { %p3684_p7 = pneg %p3683_p3  ;;  %p3690_p4 = por %p3689_p12, %p3688_p8 }
  0x77   : > { %p3691_p1 = pnand %p3690_p4, %p3684_p7 }
  0x79   : > { %3694 = shalt.err (!%p3691_p1)
}
  0x7a   : > { %3486 = dma.hbm_to_vmem [thread:$0]  (!%p4120_p10), %s4128_s16, 16, %s4163_s20, %s4169_s15  }
  0x7b   : > { %s4699_s14 = sld [smem:[#allocation24_spill]]  ;;  %p4700_p5 = scmp.ne.s32.totalorder %s4689_s3, 0 }
  0x81   : > { %s3695_s13 = scalar_lea.hbm %s4699_s14, 256 }
  0x82   : > { %p3696_p2 = scmp.ne.s32.totalorder %s4699_s14, %s3695_s13  ;;  %p3702_p11 = scmp.lt.u32.totalorder %s3695_s13, %s4699_s14 }
  0x84   : > { %p3698_p6 = pnand %p3696_p2, %p4700_p5 }
  0x86   : > { %p3699_p9 = pneg %p3698_p6 }
  0x88   : > { %p3704_p0 = pnand %p3702_p11, %p3699_p9 }
  0x8a   : > { %3707 = shalt.err (!%p3704_p0)
}
  0x8b   : > { %s3708_s12 = scalar_lea.vmem %s514_s17, 256  ;;  %p3716_p12 = scmp.lt.s32.totalorder %s514_s17, %s514_s17 }
  0x8c   : > { %p3709_p3 = scmp.ne.s32.totalorder %s514_s17, %s3708_s12  ;;  %p3717_p4 = scmp.lt.s32.totalorder %s3708_s12, %s3708_s12 }
  0x8e   : > { %p3711_p7 = pnand %p3709_p3, %p4700_p5  ;;  %p3718_p1 = por %p3717_p4, %p3716_p12 }
  0x90   : > { %p3712_p8 = pneg %p3711_p7 }
  0x92   : > { %p3719_p10 = pnand %p3718_p1, %p3712_p8 }
  0x94   : > { %3722 = shalt.err (!%p3719_p10)
}
  0x95   : > { %s3893_s16 = smov 128   ;;  %s3894_s20 = smov 8  }
  0x96   : > { %p4701_p2 = scmp.ne.s32.totalorder %s4686_s2, 0  ;;  %s3895_s22 = smov [#allocation8]  }
  0x97   : > { %s538_s13 = sshll.u32 %s3895_s22, 4  ;;  %s4216_s30 = scalar_lea.hbm %s4633_s7, %s4109_s26  ;;  %s539_s13 = int_to_ptr.vmem [resolvable:$true] %s538_s13 }
  0x98   : > { %3470 = dma.hbm_to_vmem [thread:$0]  (!%p4701_p2), %s4699_s14, 256, %s514_s17, [#allocation4], %s3893_s16, %s3893_s16, %s3894_s20  }
  0x99   : > { %s4702_s8 = sld [smem:[#allocation26_spill]] }
  0x9f   : > { %s3723_s6 = scalar_lea.hbm %s4702_s8, 16 }
  0xa0   : > { %p3724_p10 = scmp.ne.s32.totalorder %s4702_s8, %s3723_s6  ;;  %p3730_p11 = scmp.lt.u32.totalorder %s3723_s6, %s4702_s8 }
  0xa2   : > { %p3726_p6 = pnand %p3724_p10, %p4700_p5 }
  0xa4   : > { %p3727_p9 = pneg %p3726_p6 }
  0xa6   : > { %p3732_p0 = pnand %p3730_p11, %p3727_p9 }
  0xa8   : > { %3735 = shalt.err (!%p3732_p0)
}
  0xa9   : > { %s3736_s20 = scalar_lea.vmem %s539_s13, 16  ;;  %s3743_s29 = scalar_lea.vmem %s539_s13, 32 }
  0xaa   : > { %p3737_p3 = scmp.ne.s32.totalorder %s539_s13, %s3736_s20  ;;  %p3744_p12 = scmp.lt.s32.totalorder %s539_s13, %s539_s13 }
  0xab   : > { %p3745_p4 = scmp.lt.s32.totalorder %s3743_s29, %s3736_s20 }
  0xac   : > { %p3739_p7 = pnand %p3737_p3, %p4700_p5 }
  0xad   : > { %p3746_p1 = por %p3745_p4, %p3744_p12 }
  0xae   : > { %p3740_p8 = pneg %p3739_p7 }
  0xb0   : > { %p3747_p13 = pnand %p3746_p1, %p3740_p8 }
  0xb2   : > { %3750 = shalt.err (!%p3747_p13)
}
  0xb3   : > { %3476 = dma.hbm_to_vmem [thread:$0]  (!%p4701_p2), %s4702_s8, 16, %s539_s13, [#allocation7]  }
  0xb4   : > { %s594_s3 = scalar_lea.vmem [#allocation11], %s4103_s23  ;;  %s4241_s27 = scalar_lea.hbm %s4635_s9, %s4109_s26 }
  0xb5   : > { %s601_s6 = sshll.u32 %s594_s3, 4  ;;  %s3751_s2 = scalar_lea.hbm %s4216_s30, 16  ;;  %s602_s6 = int_to_ptr.vmem [resolvable:$true] %s601_s6 }
  0xb6   : > { %p3752_p13 = scmp.ne.s32.totalorder %s4216_s30, %s3751_s2  ;;  %p4703_p5 = scmp.ne.s32.totalorder %s4697_s21, 0 }
  0xb7   : > { %s3756_s12 = scalar_lea.hbm %s4633_s7, 32  ;;  %p3757_p2 = scmp.lt.u32.totalorder %s4216_s30, %s4633_s7 }
  0xb8   : > { %p3754_p10 = pnand %p3752_p13, %p4703_p5  ;;  %p3758_p9 = scmp.lt.u32.totalorder %s3756_s12, %s3751_s2 }
  0xb9   : > { %p3760_p0 = scmp.lt.u32.totalorder %s3751_s2, %s4216_s30 }
  0xba   : > { %p3755_p6 = pneg %p3754_p10  ;;  %p3759_p11 = por %p3758_p9, %p3757_p2 }
  0xbc   : > { %p3761_p3 = por %p3760_p0, %p3759_p11 }
  0xbe   : > { %p3762_p7 = pnand %p3761_p3, %p3755_p6 }
  0xc0   : > { %3765 = shalt.err (!%p3762_p7)
}
  0xc1   : > { %s3766_s26 = scalar_lea.vmem %s602_s6, 16  ;;  %s3896_s13 = smov [#allocation11]  }
  0xc2   : > { %p3767_p8 = scmp.ne.s32.totalorder %s602_s6, %s3766_s26  ;;  %s3771_s20 = sshll.u32 %s3896_s13, 4  ;;  %s3772_s20 = int_to_ptr.vmem [resolvable:$false] %s3771_s20 }
  0xc3   : > { %s3773_s29 = scalar_lea.vmem %s3772_s20, 32  ;;  %p3774_p1 = scmp.lt.s32.totalorder %s602_s6, %s3772_s20 }
  0xc4   : > { %p3769_p12 = pnand %p3767_p8, %p4703_p5  ;;  %p3775_p13 = scmp.lt.s32.totalorder %s3773_s29, %s3766_s26 }
  0xc6   : > { %p3770_p4 = pneg %p3769_p12  ;;  %p3776_p10 = por %p3775_p13, %p3774_p1 }
  0xc8   : > { %p3777_p2 = pnand %p3776_p10, %p3770_p4 }
  0xca   : > { %3780 = shalt.err (!%p3777_p2)
}
  0xcb   : > { %p4704_p9 = scmp.ne.s32.totalorder %s4694_s25, 0  ;;  %s628_s4 = scalar_lea.vmem [#allocation14], %s4103_s23 }
  0xcc   : > { %s635_s11 = sshll.u32 %s628_s4, 4  ;;  %s3781_s3 = scalar_lea.hbm %s4241_s27, 16  ;;  %s636_s11 = int_to_ptr.vmem [resolvable:$true] %s635_s11 }
  0xcd   : > { %3483 = dma.hbm_to_vmem [thread:$0]  (!%p4704_p9), %s4216_s30, 16, %s602_s6, %s4132_s18  }
  0xce   : > { %p3782_p6 = scmp.ne.s32.totalorder %s4241_s27, %s3781_s3  ;;  %s3786_s2 = scalar_lea.hbm %s4635_s9, 32 }
  0xcf   : > { %p3787_p3 = scmp.lt.u32.totalorder %s4241_s27, %s4635_s9  ;;  %p3788_p7 = scmp.lt.u32.totalorder %s3786_s2, %s3781_s3 }
  0xd0   : > { %p3784_p11 = pnand %p3782_p6, %p4703_p5  ;;  %p3790_p12 = scmp.lt.u32.totalorder %s3781_s3, %s4241_s27 }
  0xd1   : > { %p3789_p8 = por %p3788_p7, %p3787_p3 }
  0xd2   : > { %p3785_p0 = pneg %p3784_p11 }
  0xd3   : > { %p3791_p4 = por %p3790_p12, %p3789_p8 }
  0xd5   : > { %p3792_p1 = pnand %p3791_p4, %p3785_p0 }
  0xd7   : > { %3795 = shalt.err (!%p3792_p1)
}
  0xd8   : > { %s3796_s18 = scalar_lea.vmem %s636_s11, 16  ;;  %s3897_s23 = smov [#allocation14]  }
  0xd9   : > { %p3797_p13 = scmp.ne.s32.totalorder %s636_s11, %s3796_s18  ;;  %s3801_s30 = sshll.u32 %s3897_s23, 4  ;;  %s3802_s30 = int_to_ptr.vmem [resolvable:$false] %s3801_s30 }
  0xda   : > { %s3803_s6 = scalar_lea.vmem %s3802_s30, 32  ;;  %p3804_p6 = scmp.lt.s32.totalorder %s636_s11, %s3802_s30 }
  0xdb   : > { %p3799_p10 = pnand %p3797_p13, %p4703_p5  ;;  %p3805_p11 = scmp.lt.s32.totalorder %s3803_s6, %s3796_s18 }
  0xdd   : > { %p3800_p2 = pneg %p3799_p10  ;;  %p3806_p9 = por %p3805_p11, %p3804_p6 }
  0xdf   : > { %p3807_p3 = pnand %p3806_p9, %p3800_p2 }
  0xe1   : > { %3810 = shalt.err (!%p3807_p3)
}
  0xe2   : > { %p4705_p7 = scmp.ne.s32.totalorder %s4694_s25, 0  ;;  %p4706_p0 = scmp.ne.s32.totalorder %s4684_s1, 0 }
  0xe3   : > { %p4707_p5 = scmp.eq.s32.totalorder (!%p4706_p0), %s4033_s0, 0 }
  0xe4   : > { %3489 = dma.hbm_to_vmem [thread:$0]  (!%p4705_p7), %s4241_s27, 16, %s636_s11, %s4169_s15  }
  0xe5   : > { %684 = sbr.rel (%p4706_p0) target bundleno = 4946 (0x1352), region = 92 }
  0xec   : > { %3854 = dma.done.wait (%p4707_p5), [#allocation4], 256   ;;  %p4708_p8 = pmov %p4707_p5 }
  0xed   : > { %p4709_p12 = pmov %p4707_p5 }
  0xee   : > { %3856 = vsyncadd (%p4708_p8), [#allocation4], 4294967040 }
  0xef   : > { %3858 = dma.done.wait (%p4709_p12), [#allocation7], 32   ;;  %p4710_p9 = pmov %p4707_p5 }
  0xf0   : > { %s698_s25 = sand.u32 1, %s4033_s0   ;;  %s4292_s21 = sand.u32 1, %s3879_s28  }
  0xf1   : > { %3860 = vsyncadd (%p4710_p9), [#allocation7], 4294967264  ;;  %s699_s1 = scalar_lea.sflag [#allocation10], %s698_s25  ;;  %p4711_p4 = scmp.ne.s32.totalorder %s4683_s19, 0 }
  0xf3   : > { %3862 = dma.done.wait (%p4711_p4), %s699_s1, 32  }
  0xf4   : > { %3864 = vsyncadd (%p4711_p4), %s699_s1, 4294967264  ;;  %s715_s12 = scalar_lea.sflag [#allocation13], %s698_s25 }
  0xf5   : > { %3866 = dma.done.wait (%p4711_p4), %s715_s12, 32  }
  0xf6   : > { %3868 = vsyncadd (%p4711_p4), %s715_s12, 4294967264  ;;  %p816_p1 = scmp.lt.s32.totalorder %s4033_s0, 1  ;;  %s4713_s3 = sld [smem:[#allocation28_spill]] }
  0xf7   : > { %s4714_s24 = sld [smem:[#allocation30_spill]]  ;;  %s4715_s30 = sld [smem:[#allocation32_spill]] }
  0xf8   : > { %s4307_s16 = scalar_select %p816_p1, %s4033_s0, 1 }
  0xf9   : > { %s4716_s13 = sld [smem:[#allocation34_spill]]  ;;  %s4717_s19 = sld [smem:[#allocation35_spill]] }
  0xfa   : > { %s3185_s26 = sshll.u32 %s4307_s16, 5  ;;  %s3188_s25 = sshll.u32 %s4307_s16, 6 }
  0xfb   : > { %s4718_s22 = sld [smem:[#allocation36_spill]]  ;;  %s4719_s15 = sld [smem:[#allocation37_spill]] }
  0xfc   : > { %s4317_s10 = scalar_lea.vmem %s4713_s3, %s3185_s26  ;;  %p4720_p13 = scmp.ne.s32.totalorder %s4033_s0, 0 }
  0xfd   : > { %s4322_s5 = scalar_lea.vmem %s4714_s24, %s3185_s26  ;;  %s4327_s6 = scalar_lea.vmem %s4715_s30, %s3185_s26  ;;  %v852_v0 = vld [vmem:[#allocation3] sm:$0xff] (!%p4720_p13)  ;;  %vm856_vm0 = vcmask (!%p4720_p13), 261120   ;;  %v853_v1 = vld [vmem:[#allocation3 + $0x8] sm:$0xff] (!%p4720_p13)  ;;  %v3136_v21 = vld [vmem:[#allocation6] ss:$0 sm:$0xff] (!%p4720_p13) }
  0xfe   : > { %s725_s26 = scalar_lea.vmem [#allocation14], %s4292_s21  ;;  %851 = sbr.rel (%p4720_p13) target bundleno = 572 (0x23c), region = 124  ;;  %v857_v2 = vsel (!%p4720_p13), %vm856_vm0, %v852_v0, 0.0  ;;  %v860_v3 = vsel (!%p4720_p13), %vm856_vm0, %v853_v1, 0.0  ;;  %v3137_v23 = vld [vmem:[#allocation8] ss:$0 sm:$0xff] (!%p4720_p13) }
  0xff   : > { %s4333_s20 = scalar_lea.vmem %s4716_s13, %s3188_s25  ;;  %s841_s3 = scalar_lea.vmem %s4717_s19, %s4307_s16  ;;  %858 = vadd.xlane.f32.xlu0 (!%p4720_p13), %v857_v2 }
 0x101   : > { %s844_s2 = scalar_lea.vmem %s4718_s22, %s4307_s16  ;;  %s847_s18 = scalar_lea.vmem %s4719_s15, %s4307_s16 }
 0x103   : > { %861 = vadd.xlane.f32.xlu0 (!%p4720_p13), %v860_v3 }
 0x18c   : > { %v859_v4 = vpop.xlane.xlu0 %858 }
 0x18d   : > { %v864_v5 = vmul.f32 0.03125, %v859_v4 }
 0x18f   : > { %v866_v6 = vsub.f32 %v852_v0, %v864_v5 }
 0x190   : > { %v862_v7 = vpop.xlane.xlu0 %861 }
 0x191   : > { %v865_v8 = vmul.f32 0.03125, %v862_v7  ;;  %v868_v9 = vmul.f32 %v866_v6, %v866_v6 }
 0x193   : > { %v867_v10 = vsub.f32 %v853_v1, %v865_v8  ;;  %v870_v11 = vsel %vm856_vm0, %v868_v9, 0.0 }
 0x194   : > { %871 = vadd.xlane.f32.xlu1 %v870_v11 }
 0x195   : > { %v869_v12 = vmul.f32 %v867_v10, %v867_v10 }
 0x197   : > { %v873_v13 = vsel %vm856_vm0, %v869_v12, 0.0 }
 0x198   : > { %874 = vadd.xlane.f32.xlu1 %v873_v13 }
 0x221   : > { %v872_v14 = vpop.xlane.xlu1 %871 }
 0x222   : > { %v876_v15 = vmul.f32 0.03125, %v872_v14 }
 0x224   : > { %v878_v16 = vadd.f32 1e-12, %v876_v15 }
 0x225   : > { %v875_v17 = vpop.xlane.xlu1 %874 }
 0x226   : > { %3557 = vrsqrt.f32 %v878_v16  ;;  %v877_v18 = vmul.f32 0.03125, %v875_v17 }
 0x228   : > { %v879_v19 = vadd.f32 1e-12, %v877_v18 }
 0x22a   : > { %3559 = vrsqrt.f32 %v879_v19 }
 0x230   : > { %v3558_v20 = vpop.eup %3557 }
 0x231   : > { %v882_v22 = vmul.f32 %v3558_v20, %v866_v6 }
 0x233   : > { %v890_v24 = vmul.f32 %v3136_v21, %v882_v22 }
 0x234   : > { %v3560_v25 = vpop.eup %3559 }
 0x235   : > { %v898_v26 = vadd.f32 %v3137_v23, %v890_v24  ;;  %v883_v27 = vmul.f32 %v3560_v25, %v867_v10 }
 0x237   : > { %900 = vst.msk [vmem:[#allocation2] sm:$0xff] %vm856_vm0, %v898_v26  ;;  %v891_v28 = vmul.f32 %v3136_v21, %v883_v27 }
 0x239   : > { %v899_v29 = vadd.f32 %v3137_v23, %v891_v28 }
 0x23b   : > { %901 = vst.msk [vmem:[#allocation2 + $0x8] sm:$0xff] %vm856_vm0, %v899_v29 }
 0x23c PF: > { %v904_v30 = vld [vmem:[%s4317_s10] sm:$0xff]  ;;  %v905_v31 = vld [vmem:[%s4317_s10 + $0x8] sm:$0xff]  ;;  %v906_v32 = vld [vmem:[%s4317_s10 + $0x10] sm:$0xff]  ;;  %vm915_vm1 = vcmask 261120   ;;  %v3898_v38 = vmov 0.0   ;;  %vm3899_vm2 = vmmov 0   ;;  %v1004_v48 = vlaneseq }
 0x23d   : > { %v3397_v33 = vpack.c.bf16 %v905_v31, %v904_v30  ;;  %v907_v34 = vld [vmem:[%s4317_s10 + $0x18] sm:$0xff]  ;;  %3275 = vmatprep.subr.mxu0 %v3898_v38  ;;  %3277 = vmatprep.mubr.msk.f32.mxu0 %vm3899_vm2, %v3898_v38  ;;  %s4721_s15 = scalar_lea.vmem [#allocation9], %s4292_s21  ;;  %s3900_s27 = smov 96   ;;  %vm1026_vm3 = vcmask 64512   ;;  %v3901_v46 = vmov 1966171168  }
 0x23e   : > { %v4360_v35 = vld [vmem:[#allocation2] sm:$0xff]  ;;  %v3401_v36 = vpack.c.bf16 %v907_v34, %v906_v32  ;;  %v1002_v47 = vunpack.c.l.s4 %v3901_v46  ;;  %s4722_s10 = sld [smem:[#allocation27_spill]]  ;;  %v1005_v52 = vshrl.u32 %v1004_v48, 7  ;;  %s3902_s23 = smov 64   ;;  %vm2397_vm4 = vcmask 195584  }
 0x23f   : > { %3262 = vmatprep.mubr.msk.f32.mxu1 %vm915_vm1, %v4360_v35  ;;  %3398 = vmatprep.subr.bf16.mxu1 %v3397_v33  ;;  %v3138_v39 = vld [vmem:[%s4721_s15] ss:$0 sm:$0xff]  ;;  %s3903_s30 = smov 88   ;;  %s3904_s25 = smov 120   ;;  %vm2394_vm5 = vcmask 130048   ;;  %vm2664_vm6 = vcmask 523264  }
 0x240   : > { %3400 = vmatpush3.bf16.msra.mxu1 %v3397_v33  ;;  %v1003_v51 = vunpack.c.0.s8 %v1002_v47  ;;  %v1182_v57 = vsub.s32 0, %v1005_v52  ;;  %s3905_s1 = smov 56   ;;  %s3906_s12 = smov 80  }
 0x241   : > { %3402 = vmatprep.subr.bf16.mxu1 %v3401_v36  ;;  %s3907_s13 = smov 112   ;;  %s3908_s29 = smov 48  }
 0x242   : > { %v4364_v37 = vld [vmem:[#allocation2 + $0x8] sm:$0xff]  ;;  %v1006_v54 = vsub.s32 %v1003_v51, %v1005_v52  ;;  %s3909_s11 = smov 72   ;;  %s3910_s19 = smov 104  }
 0x243   : > { %s3911_s22 = smov 40   ;;  %s3912_s24 = smov 8  }
 0x244   : > { %3404 = vmatpush3.bf16.msra.mxu1 %v3401_v36  ;;  %v997_v49 = vld [vmem:[%s4722_s10] sm:$0x3]  ;;  %s3913_s15 = smov 16   ;;  %s4724_s17 = scalar_lea.vmem [#allocation12], %s4292_s21 }
 0x245   : > { %3265 = vmatprep.subr.mxu1 %v3898_v38  ;;  %v998_v50 = vsub.f32 1.0, %v997_v49  ;;  %p3178_p10 = scmp.ne.s32.totalorder %s4033_s0, 1 }
 0x246   : > { %vm3916_vm7 = vmmov (!%p3178_p10), 0   ;;  %vm2801_vm8 = vcmask (!%p3178_p10), 1040384   ;;  %vm2888_vm9 = vcmask (!%p3178_p10), 254976  }
 0x247   : > { %3263 = vmatmul.mubr.msk.f32.vlgmr.msra.gmra.mrb[0].mxu1 %vm915_vm1, %v4364_v37  ;;  %v999_v53 = vmul.f32 -1e+09, %v998_v50 }
 0x248   : > { %3267 = vmatprep.mubr.msk.f32.mxu1 %vm3899_vm2, %v3898_v38 }
 0x249   : > { %v1007_v55 = vrot.slane %v999_v53, %v1006_v54 }
 0x24b   : > { %v1015_v56 = vrot.slane %v1007_v55, %v1006_v54  ;;  %v1008_v58 = vcombine.high %v1007_v55, %v1007_v55 }
 0x24d   : > { %v4397_v59 = vrot.slane %v1015_v56, %v1182_v57  ;;  %v1022_v60 = vrot.slane %v1008_v58, %v1006_v54 }
 0x24f   : > { %v4400_v1 = vrot.slane %v1022_v60, %v1182_v57 }
 0x31a   : > { %v3264_v40 = vpop.f32.mrb[0].mxu1 }
 0x31b   : > { %v988_v41 = vpop.f32.mrb[1].mxu1  ;;  %v4379_v43 = vadd.f32 %v3264_v40, %v3138_v39 }
 0x31c   : > { %v4376_v42 = vadd.f32 %v3138_v39, %v988_v41 }
 0x31e   : > { %1024 = vrot.lane.b32.xlu0 %v4376_v42, %s3900_s27 }
 0x322   : > { %1102 = vrot.lane.b32.xlu0 %v4379_v43, %s3900_s27  ;;  %s3914_s27 = smov 24  }
 0x390   : > { %v1025_v44 = vpop.permute.xlu0 %1024 }
 0x391   : > { %3266 = vmatpush3.xpose.msk.msra.mxu1 %vm1026_vm3, %v1025_v44 }
 0x392   : > { %3270 = vmatprep.subr.mxu1 %v3898_v38 }
 0x394   : > { %3268 = vmatmul.mubr.msk.f32.vlgmr.msra.gmra.mrb[2].mxu1 %vm1026_vm3, %v4376_v42  ;;  %v1103_v45 = vpop.permute.xlu0 %1102 }
 0x395   : > { %3271 = vmatpush3.xpose.msk.msra.mxu1 %vm1026_vm3, %v1103_v45  ;;  %3272 = vmatprep.mubr.msk.f32.mxu1 %vm3899_vm2, %v3898_v38 }
 0x396   : > { %3280 = vmatprep.subr.mxu1 %v3898_v38 }
 0x398   : > { %3273 = vmatmul.mubr.msk.f32.vlgmr.msra.gmra.mrb[4].mxu1 %vm1026_vm3, %v4379_v43 }
 0x399   : > { %3282 = vmatprep.mubr.msk.f32.mxu1 %vm3899_vm2, %v3898_v38 }
 0x467   : > { %v1097_v61 = vpop.f32.mrb[2].mxu1 }
 0x468   : > { %v1178_v62 = vmul.f32 0.35355338, %v1097_v61  ;;  %v3269_v63 = vpop.f32.mrb[3].mxu1 }
 0x46a   : > { %v1190_v0 = vadd.f32 %v4397_v59, %v1178_v62 }
 0x46b   : > { %v1174_v2 = vpop.f32.mrb[4].mxu1 }
 0x46c   : > { %v1179_v3 = vmul.f32 0.35355338, %v1174_v2  ;;  %v3274_v4 = vpop.f32.mrb[5].mxu1  ;;  %v1192_v5 = vsel %vm1026_vm3, %v1190_v0, -inf }
 0x46d   : > { %1193 = vmax.xlane.f32.xlu1 %v1192_v5 }
 0x46e   : > { %v1191_v6 = vadd.f32 %v4400_v1, %v1179_v3 }
 0x470   : > { %v1195_v7 = vsel %vm1026_vm3, %v1191_v6, -inf }
 0x471   : > { %1196 = vmax.xlane.f32.xlu1 %v1195_v7 }
 0x482   : > { %1214 = vrot.lane.b32.xlu1 %v4376_v42, %s3902_s23 }
 0x486   : > { %1290 = vrot.lane.b32.xlu1 %v4379_v43, %s3902_s23 }
 0x48a   : > { %1368 = vrot.lane.b32.xlu1 %v4376_v42, %s3903_s30 }
 0x48e   : > { %1446 = vrot.lane.b32.xlu1 %v4379_v43, %s3903_s30 }
 0x4fa   : > { %v1194_v8 = vpop.xlane.xlu1 %1193 }
 0x4fb   : > { %v1198_v9 = vsub.f32 %v1190_v0, %v1194_v8 }
 0x4fd   : > { %v1200_v10 = vmul.f32 1.442695, %v1198_v9 }
 0x4fe   : > { %v1197_v11 = vpop.xlane.xlu1 %1196 }
 0x4ff   : > { %3561 = vpow2.f32 %v1200_v10  ;;  %v1199_v12 = vsub.f32 %v1191_v6, %v1197_v11 }
 0x501   : > { %v1202_v13 = vmul.f32 1.442695, %v1199_v12 }
 0x502   : > { %v1215_v14 = vpop.permute.xlu1 %1214 }
 0x503   : > { %3563 = vpow2.f32 %v1202_v13  ;;  %3276 = vmatpush3.msra.mxu0 %v1215_v14 }
 0x504   : > { %3285 = vmatprep.subr.mxu0 %v3898_v38 }
 0x506   : > { %v1291_v15 = vpop.permute.xlu1 %1290 }
 0x507   : > { %3281 = vmatpush3.msra.mxu1 %v1291_v15 }
 0x508   : > { %3290 = vmatprep.subr.mxu1 %v3898_v38 }
 0x509   : > { %v3562_v16 = vpop.eup %3561 }
 0x50a   : > { %v1204_v17 = vsel %vm1026_vm3, %v3562_v16, 0.0  ;;  %v1369_v20 = vpop.permute.xlu1 %1368 }
 0x50b   : > { %1205 = vadd.xlane.f32.xlu0 %v1204_v17 }
 0x50d   : > { %v3564_v18 = vpop.eup %3563 }
 0x50e   : > { %v1207_v19 = vsel %vm1026_vm3, %v3564_v18, 0.0  ;;  %v1447_v21 = vpop.permute.xlu1 %1446 }
 0x50f   : > { %1208 = vadd.xlane.f32.xlu1 %v1207_v19 }
 0x520   : > { %1444 = vrot.lane.b32.xlu1 %v4379_v43, %s3904_s25 }
 0x521   : > { %1366 = vrot.lane.b32.xlu0 %v4376_v42, %s3904_s25 }
 0x598   : > { %v1206_v22 = vpop.xlane.xlu0 %1205 }
 0x599   : > { %3565 = vrcp.f32 %v1206_v22 }
 0x59c   : > { %v1209_v23 = vpop.xlane.xlu1 %1208  ;;  %v1367_v28 = vpop.permute.xlu0 %1366 }
 0x59d   : > { %3567 = vrcp.f32 %v1209_v23 }
 0x5a0   : > { %v1445_v29 = vpop.permute.xlu1 %1444 }
 0x5a3   : > { %v3566_v24 = vpop.eup %3565 }
 0x5a4   : > { %v1212_v25 = vmul.f32 %v3566_v24, %v3562_v16 }
 0x5a6   : > { %3278 = vmatmul.mubr.msk.f32.vlgmr.msra.gmra.mrb[0].mxu0 %vm1026_vm3, %v1212_v25 }
 0x5a7   : > { %v3568_v26 = vpop.eup %3567  ;;  %3286 = vmatpush3.xpose.msk.msra.mxu0 %vm1026_vm3, %v1369_v20  ;;  %3287 = vmatprep.mubr.msk.f32.mxu0 %vm3899_vm2, %v3898_v38 }
 0x5a8   : > { %v1213_v27 = vmul.f32 %v3568_v26, %v3564_v18  ;;  %3295 = vmatprep.subr.mxu0 %v3898_v38 }
 0x5aa   : > { %3283 = vmatmul.mubr.msk.f32.vlgmr.msra.gmra.mrb[6].mxu1 %vm1026_vm3, %v1213_v27  ;;  %3288 = vmatmul.mubr.msk.f32.vlgmr.msra.gmra.mrb[2].mxu0 %vm1026_vm3, %v1367_v28 }
 0x5ab   : > { %3291 = vmatpush3.xpose.msk.msra.mxu1 %vm1026_vm3, %v1447_v21  ;;  %3292 = vmatprep.mubr.msk.f32.mxu1 %vm3899_vm2, %v3898_v38 }
 0x5ac   : > { %3300 = vmatprep.subr.mxu1 %v3898_v38  ;;  %3297 = vmatprep.mubr.msk.f32.mxu0 %vm3899_vm2, %v3898_v38 }
 0x5ae   : > { %3293 = vmatmul.mubr.msk.f32.vlgmr.msra.gmra.mrb[8].mxu1 %vm1026_vm3, %v1445_v29 }
 0x5af   : > { %3302 = vmatprep.mubr.msk.f32.mxu1 %vm3899_vm2, %v3898_v38 }
 0x679   : > { %v4431_v30 = vpop.f32.mrb[0].mxu0 }
 0x67a   : > { %v3279_v31 = vpop.f32.mrb[1].mxu0 }
 0x67d   : > { %v4433_v32 = vpop.f32.mrb[6].mxu1  ;;  %v1440_v33 = vpop.f32.mrb[2].mxu0 }
 0x67e   : > { %v1522_v34 = vmul.f32 0.35355338, %v1440_v33  ;;  %v3284_v36 = vpop.f32.mrb[7].mxu1  ;;  %v3289_v39 = vpop.f32.mrb[3].mxu0 }
 0x680   : > { %v1524_v40 = vadd.f32 %v1522_v34, %v4397_v59 }
 0x681   : > { %v1518_v41 = vpop.f32.mrb[8].mxu1 }
 0x682   : > { %v1523_v44 = vmul.f32 0.35355338, %v1518_v41  ;;  %v3294_v45 = vpop.f32.mrb[9].mxu1  ;;  %v1526_v46 = vsel %vm1026_vm3, %v1524_v40, -inf }
 0x683   : > { %1527 = vmax.xlane.f32.xlu1 %v1526_v46 }
 0x684   : > { %v1525_v47 = vadd.f32 %v1523_v44, %v4400_v1 }
 0x686   : > { %v1529_v48 = vsel %vm1026_vm3, %v1525_v47, -inf }
 0x687   : > { %1530 = vmax.xlane.f32.xlu0 %v1529_v48 }
 0x694   : > { %1548 = vrot.lane.b32.xlu1 %v4376_v42, %s3905_s1 }
 0x698   : > { %1702 = vrot.lane.b32.xlu1 %v4376_v42, %s3906_s12 }
 0x69c   : > { %1780 = vrot.lane.b32.xlu1 %v4379_v43, %s3906_s12 }
 0x69d   : > { %1624 = vrot.lane.b32.xlu0 %v4379_v43, %s3905_s1 }
 0x6a1   : > { %1700 = vrot.lane.b32.xlu0 %v4376_v42, %s3907_s13 }
 0x710   : > { %v1528_v49 = vpop.xlane.xlu1 %1527 }
 0x711   : > { %v1532_v50 = vsub.f32 %v1524_v40, %v1528_v49 }
 0x713   : > { %v1534_v51 = vmul.f32 1.442695, %v1532_v50 }
 0x714   : > { %v1549_v52 = vpop.permute.xlu1 %1548  ;;  %v1531_v53 = vpop.xlane.xlu0 %1530 }
 0x715   : > { %3569 = vpow2.f32 %v1534_v51  ;;  %v1533_v54 = vsub.f32 %v1525_v47, %v1531_v53  ;;  %3296 = vmatpush3.msra.mxu0 %v1549_v52 }
 0x716   : > { %3305 = vmatprep.subr.mxu0 %v3898_v38 }
 0x717   : > { %v1536_v55 = vmul.f32 1.442695, %v1533_v54 }
 0x718   : > { %v1625_v56 = vpop.permute.xlu0 %1624  ;;  %v1703_v62 = vpop.permute.xlu1 %1702 }
 0x719   : > { %3571 = vpow2.f32 %v1536_v55  ;;  %3301 = vmatpush3.msra.mxu1 %v1625_v56 }
 0x71a   : > { %3310 = vmatprep.subr.mxu1 %v3898_v38 }
 0x71c   : > { %v1781_v63 = vpop.permute.xlu1 %1780  ;;  %v1701_v7 = vpop.permute.xlu0 %1700 }
 0x71f   : > { %v3570_v57 = vpop.eup %3569 }
 0x720   : > { %v1538_v58 = vsel %vm1026_vm3, %v3570_v57, 0.0 }
 0x721   : > { %1539 = vadd.xlane.f32.xlu1 %v1538_v58 }
 0x723   : > { %v3572_v60 = vpop.eup %3571 }
 0x724   : > { %v1541_v61 = vsel %vm1026_vm3, %v3572_v60, 0.0 }
 0x725   : > { %1542 = vadd.xlane.f32.xlu1 %v1541_v61 }
 0x736   : > { %1778 = vrot.lane.b32.xlu1 %v4379_v43, %s3907_s13 }
 0x7ae   : > { %v1540_v0 = vpop.xlane.xlu1 %1539 }
 0x7af   : > { %3573 = vrcp.f32 %v1540_v0 }
 0x7b2   : > { %v1543_v2 = vpop.xlane.xlu1 %1542 }
 0x7b3   : > { %3575 = vrcp.f32 %v1543_v2 }
 0x7b6   : > { %v1779_v8 = vpop.permute.xlu1 %1778 }
 0x7b9   : > { %v3574_v3 = vpop.eup %3573 }
 0x7ba   : > { %v1546_v4 = vmul.f32 %v3574_v3, %v3570_v57 }
 0x7bc   : > { %3298 = vmatmul.mubr.msk.f32.vlgmr.msra.gmra.mrb[4].mxu0 %vm1026_vm3, %v1546_v4 }
 0x7bd   : > { %v3576_v5 = vpop.eup %3575  ;;  %3306 = vmatpush3.xpose.msk.msra.mxu0 %vm1026_vm3, %v1703_v62  ;;  %3307 = vmatprep.mubr.msk.f32.mxu0 %vm3899_vm2, %v3898_v38 }
 0x7be   : > { %v1547_v6 = vmul.f32 %v3576_v5, %v3572_v60  ;;  %3315 = vmatprep.subr.mxu0 %v3898_v38 }
 0x7c0   : > { %3303 = vmatmul.mubr.msk.f32.vlgmr.msra.gmra.mrb[10].mxu1 %vm1026_vm3, %v1547_v6  ;;  %3308 = vmatmul.mubr.msk.f32.vlgmr.msra.gmra.mrb[6].mxu0 %vm1026_vm3, %v1701_v7 }
 0x7c1   : > { %3311 = vmatpush3.xpose.msk.msra.mxu1 %vm1026_vm3, %v1781_v63  ;;  %3312 = vmatprep.mubr.msk.f32.mxu1 %vm3899_vm2, %v3898_v38 }
 0x7c2   : > { %3320 = vmatprep.subr.mxu1 %v3898_v38  ;;  %3317 = vmatprep.mubr.msk.f32.mxu0 %vm3899_vm2, %v3898_v38 }
 0x7c4   : > { %3313 = vmatmul.mubr.msk.f32.vlgmr.msra.gmra.mrb[12].mxu1 %vm1026_vm3, %v1779_v8 }
 0x7c5   : > { %3322 = vmatprep.mubr.msk.f32.mxu1 %vm3899_vm2, %v3898_v38 }
 0x88f   : > { %v4465_v9 = vpop.f32.mrb[4].mxu0 }
 0x890   : > { %v3299_v10 = vpop.f32.mrb[5].mxu0 }
 0x893   : > { %v4467_v11 = vpop.f32.mrb[10].mxu1  ;;  %v1774_v12 = vpop.f32.mrb[6].mxu0 }
 0x894   : > { %v1856_v13 = vmul.f32 0.35355338, %v1774_v12  ;;  %v3304_v14 = vpop.f32.mrb[11].mxu1  ;;  %v3309_v15 = vpop.f32.mrb[7].mxu0 }
 0x896   : > { %v1858_v16 = vadd.f32 %v1856_v13, %v4397_v59 }
 0x897   : > { %v1852_v17 = vpop.f32.mrb[12].mxu1 }
 0x898   : > { %v1857_v18 = vmul.f32 0.35355338, %v1852_v17  ;;  %v3314_v19 = vpop.f32.mrb[13].mxu1  ;;  %v1860_v20 = vsel %vm1026_vm3, %v1858_v16, -inf }
 0x899   : > { %1861 = vmax.xlane.f32.xlu0 %v1860_v20  ;;  %v2401_v19 = vld [vmem:[%s4322_s5 + $0x8] sm:$0xff]  ;;  %v2402_v20 = vld [vmem:[%s4322_s5 + $0x10] sm:$0xff] }
 0x89a   : > { %v1859_v21 = vadd.f32 %v1857_v18, %v4400_v1  ;;  %v2400_v18 = vld [vmem:[%s4322_s5] sm:$0xff] }
 0x89c   : > { %v1863_v22 = vsel %vm1026_vm3, %v1859_v21, -inf }
 0x89d   : > { %1864 = vmax.xlane.f32.xlu1 %v1863_v22 }
 0x8ae   : > { %1882 = vrot.lane.b32.xlu1 %v4376_v42, %s3908_s29 }
 0x8af   : > { %1958 = vrot.lane.b32.xlu0 %v4379_v43, %s3908_s29 }
 0x8b2   : > { %2036 = vrot.lane.b32.xlu1 %v4376_v42, %s3909_s11 }
 0x8b6   : > { %2114 = vrot.lane.b32.xlu1 %v4379_v43, %s3909_s11  ;;  %s4730_s11 = sld [smem:[#allocation38_spill]] (!%p3178_p10) }
 0x8ba   : > { %2112 = vrot.lane.b32.xlu1 %v4379_v43, %s3910_s19 }
 0x926   : > { %v1862_v23 = vpop.xlane.xlu0 %1861 }
 0x927   : > { %v1866_v24 = vsub.f32 %v1858_v16, %v1862_v23 }
 0x929   : > { %v1868_v25 = vmul.f32 1.442695, %v1866_v24 }
 0x92a   : > { %v1865_v26 = vpop.xlane.xlu1 %1864  ;;  %v1959_v27 = vpop.permute.xlu0 %1958 }
 0x92b   : > { %3577 = vpow2.f32 %v1868_v25  ;;  %v1867_v28 = vsub.f32 %v1859_v21, %v1865_v26  ;;  %3321 = vmatpush3.msra.mxu1 %v1959_v27  ;;  %v2403_v21 = vld [vmem:[%s4322_s5 + $0x18] sm:$0xff]  ;;  %s4723_s5 = scalar_lea.vmem [#allocation11], %s4292_s21 }
 0x92c   : > { %3330 = vmatprep.subr.mxu1 %v3898_v38  ;;  %v3409_v22 = vpack.c.bf16 %v2403_v21, %v2402_v20  ;;  %v2652_v20 = vld [vmem:[%s4333_s20 + $0x18] sm:$0xff] }
 0x92d   : > { %v1870_v29 = vmul.f32 1.442695, %v1867_v28 }
 0x92e   : > { %v1883_v31 = vpop.permute.xlu1 %1882 }
 0x92f   : > { %3579 = vpow2.f32 %v1870_v29  ;;  %3316 = vmatpush3.msra.mxu0 %v1883_v31 }
 0x930   : > { %3325 = vmatprep.subr.mxu0 %v3898_v38 }
 0x932   : > { %v2037_v44 = vpop.permute.xlu1 %2036 }
 0x935   : > { %v3578_v33 = vpop.eup %3577 }
 0x936   : > { %v1872_v34 = vsel %vm1026_vm3, %v3578_v33, 0.0  ;;  %v2115_v48 = vpop.permute.xlu1 %2114 }
 0x937   : > { %1873 = vadd.xlane.f32.xlu0 %v1872_v34 }
 0x939   : > { %v3580_v36 = vpop.eup %3579 }
 0x93a   : > { %v1875_v39 = vsel %vm1026_vm3, %v3580_v36, 0.0  ;;  %v2113_v51 = vpop.permute.xlu1 %2112 }
 0x93b   : > { %1876 = vadd.xlane.f32.xlu0 %v1875_v39 }
 0x951   : > { %2034 = vrot.lane.b32.xlu0 %v4376_v42, %s3910_s19 }
 0x9c4   : > { %v1874_v40 = vpop.xlane.xlu0 %1873 }
 0x9c5   : > { %3581 = vrcp.f32 %v1874_v40 }
 0x9c8   : > { %v1877_v41 = vpop.xlane.xlu0 %1876 }
 0x9c9   : > { %3583 = vrcp.f32 %v1877_v41 }
 0x9cc   : > { %v2035_v50 = vpop.permute.xlu0 %2034 }
 0x9cf   : > { %v3582_v45 = vpop.eup %3581 }
 0x9d0   : > { %v1880_v46 = vmul.f32 %v3582_v45, %v3578_v33 }
 0x9d2   : > { %3318 = vmatmul.mubr.msk.f32.vlgmr.msra.gmra.mrb[8].mxu0 %vm1026_vm3, %v1880_v46  ;;  %v3165_v46 = vld [vmem:[%s4723_s5] ss:$0 sm:$0xff] }
 0x9d3   : > { %v3584_v47 = vpop.eup %3583  ;;  %3326 = vmatpush3.xpose.msk.msra.mxu0 %vm1026_vm3, %v2037_v44  ;;  %3327 = vmatprep.mubr.msk.f32.mxu0 %vm3899_vm2, %v3898_v38 }
 0x9d4   : > { %v1881_v49 = vmul.f32 %v3584_v47, %v3580_v36  ;;  %3335 = vmatprep.subr.mxu0 %v3898_v38 }
 0x9d6   : > { %3323 = vmatmul.mubr.msk.f32.vlgmr.msra.gmra.mrb[14].mxu1 %vm1026_vm3, %v1881_v49  ;;  %3328 = vmatmul.mubr.msk.f32.vlgmr.msra.gmra.mrb[10].mxu0 %vm1026_vm3, %v2035_v50 }
 0x9d7   : > { %3331 = vmatpush3.xpose.msk.msra.mxu1 %vm1026_vm3, %v2115_v48  ;;  %3332 = vmatprep.mubr.msk.f32.mxu1 %vm3899_vm2, %v3898_v38 }
 0x9d8   : > { %3340 = vmatprep.subr.mxu1 %v3898_v38  ;;  %3337 = vmatprep.mubr.msk.f32.mxu0 %vm3899_vm2, %v3898_v38 }
 0x9da   : > { %3333 = vmatmul.mubr.msk.f32.vlgmr.msra.gmra.mrb[16].mxu1 %vm1026_vm3, %v2113_v51 }
 0x9db   : > { %3342 = vmatprep.mubr.msk.f32.mxu1 %vm3899_vm2, %v3898_v38 }
 0xaa5   : > { %v1954_v52 = vpop.f32.mrb[8].mxu0 }
 0xaa6   : > { %v3319_v53 = vpop.f32.mrb[9].mxu0 }
 0xaa9   : > { %v2030_v54 = vpop.f32.mrb[14].mxu1  ;;  %v2108_v55 = vpop.f32.mrb[10].mxu0 }
 0xaaa   : > { %v2190_v56 = vmul.f32 0.35355338, %v2108_v55  ;;  %v3324_v57 = vpop.f32.mrb[15].mxu1  ;;  %v3329_v58 = vpop.f32.mrb[11].mxu0 }
 0xaac   : > { %v2192_v60 = vadd.f32 %v2190_v56, %v4397_v59 }
 0xaad   : > { %v2186_v61 = vpop.f32.mrb[16].mxu1 }
 0xaae   : > { %v2191_v62 = vmul.f32 0.35355338, %v2186_v61  ;;  %v3334_v63 = vpop.f32.mrb[17].mxu1  ;;  %v2194_v0 = vsel %vm1026_vm3, %v2192_v60, -inf }
 0xaaf   : > { %2195 = vmax.xlane.f32.xlu0 %v2194_v0  ;;  %v2540_v63 = vld [vmem:[%s4327_s6 + $0x8] sm:$0xff] }
 0xab0   : > { %v2193_v2 = vadd.f32 %v2191_v62, %v4400_v1  ;;  %v2539_v62 = vld [vmem:[%s4327_s6] sm:$0xff] }
 0xab1   : > { %v3413_v0 = vpack.c.bf16 %v2540_v63, %v2539_v62 }
 0xab2   : > { %v2197_v3 = vsel %vm1026_vm3, %v2193_v2, -inf }
 0xab3   : > { %2198 = vmax.xlane.f32.xlu1 %v2197_v3  ;;  %v2542_v3 = vld [vmem:[%s4327_s6 + $0x18] sm:$0xff] }
 0xac4   : > { %2216 = vrot.lane.b32.xlu1 %v4376_v42, %s3911_s22 }
 0xac8   : > { %2370 = vrot.lane.b32.xlu1 %v4465_v9, %s3912_s24 }
 0xacc   : > { %2372 = vrot.lane.b32.xlu1 %v4467_v11, %s3912_s24 }
 0xad0   : > { %2380 = vrot.lane.b32.xlu1 %v2030_v54, %s3913_s15 }
 0xb3c   : > { %v2196_v38 = vpop.xlane.xlu0 %2195 }
 0xb3d   : > { %v2200_v59 = vsub.f32 %v2192_v60, %v2196_v38 }
 0xb3f   : > { %v2202_v4 = vmul.f32 1.442695, %v2200_v59 }
 0xb40   : > { %v2199_v5 = vpop.xlane.xlu1 %2198 }
 0xb41   : > { %3585 = vpow2.f32 %v2202_v4  ;;  %v2201_v6 = vsub.f32 %v2193_v2, %v2199_v5  ;;  %v2541_v2 = vld [vmem:[%s4327_s6 + $0x10] sm:$0xff] }
 0xb42   : > { %v3417_v38 = vpack.c.bf16 %v2542_v3, %v2541_v2 }
 0xb43   : > { %v2204_v1 = vmul.f32 1.442695, %v2201_v6 }
 0xb44   : > { %v2217_v7 = vpop.permute.xlu1 %2216 }
 0xb45   : > { %3587 = vpow2.f32 %v2204_v1  ;;  %3336 = vmatpush3.msra.mxu0 %v2217_v7 }
 0xb48   : > { %v2371_v27 = vpop.permute.xlu1 %2370 }
 0xb49   : > { %v2392_v31 = vsel %vm1026_vm3, %v4431_v30, %v2371_v27 }
 0xb4b   : > { %v3586_v8 = vpop.eup %3585 }
 0xb4c   : > { %v2206_v42 = vsel %vm1026_vm3, %v3586_v8, 0.0  ;;  %v2373_v28 = vpop.permute.xlu1 %2372 }
 0xb4d   : > { %2207 = vadd.xlane.f32.xlu0 %v2206_v42  ;;  %v2393_v40 = vsel %vm1026_vm3, %v4433_v32, %v2373_v28  ;;  %v3168_v42 = vld [vmem:[%s4724_s17] ss:$0 sm:$0xff]  ;;  %s4731_s17 = sld [smem:[#allocation39_spill]] (!%p3178_p10) }
 0xb4f   : > { %v3588_v10 = vpop.eup %3587 }
 0xb50   : > { %v2209_v9 = vsel %vm1026_vm3, %v3588_v10, 0.0  ;;  %v2381_v33 = vpop.permute.xlu1 %2380 }
 0xb51   : > { %2210 = vadd.xlane.f32.xlu0 %v2209_v9  ;;  %v2396_v41 = vsel %vm2394_vm5, %v2393_v40, %v2381_v33  ;;  %v3169_v9 = vld [vmem:[%s725_s26] ss:$0 sm:$0xff]  ;;  %s4725_s26 = sld [smem:[#allocation33_spill]] }
 0xb57   : > { %s4726_s4 = scalar_lea.vmem %s4725_s26, %s4307_s16 }
 0xb58   : > { %v3170_v28 = vld [vmem:[%s4726_s4] ss:$0 sm:$0xff] }
 0xb67   : > { %2292 = vrot.lane.b32.xlu0 %v4379_v43, %s3911_s22  ;;  %v3405_v43 = vpack.c.bf16 %v2401_v19, %v2400_v18  ;;  %v2650_v18 = vld [vmem:[%s4333_s20 + $0x8] sm:$0xff] }
 0xb69   : > { %3406 = vmatprep.subr.bf16.mxu0 %v3405_v43 }
 0xb6b   : > { %2378 = vrot.lane.b32.xlu0 %v1954_v52, %s3913_s15 }
 0xbda   : > { %v2208_v11 = vpop.xlane.xlu0 %2207 }
 0xbdb   : > { %3589 = vrcp.f32 %v2208_v11 }
 0xbde   : > { %v2211_v12 = vpop.xlane.xlu0 %2210 }
 0xbdf   : > { %3591 = vrcp.f32 %v2211_v12 }
 0xbe2   : > { %v2293_v13 = vpop.permute.xlu0 %2292 }
 0xbe3   : > { %3341 = vmatpush3.msra.mxu1 %v2293_v13 }
 0xbe4   : > { %3414 = vmatprep.subr.bf16.mxu1 %v3413_v0 }
 0xbe5   : > { %v3590_v14 = vpop.eup %3589 }
 0xbe6   : > { %v2214_v15 = vmul.f32 %v3590_v14, %v3586_v8  ;;  %v2379_v29 = vpop.permute.xlu0 %2378 }
 0xbe7   : > { %v2395_v34 = vsel %vm2394_vm5, %v2392_v31, %v2379_v29 }
 0xbe8   : > { %3338 = vmatmul.mubr.msk.f32.vlgmr.msra.gmra.mrb[12].mxu0 %vm1026_vm3, %v2214_v15 }
 0xbe9   : > { %v3592_v16 = vpop.eup %3591  ;;  %3408 = vmatpush3.bf16.msra.mxu0 %v3405_v43  ;;  %v2651_v43 = vld [vmem:[%s4333_s20 + $0x10] sm:$0xff] }
 0xbea   : > { %v2215_v17 = vmul.f32 %v3592_v16, %v3588_v10  ;;  %3410 = vmatprep.subr.bf16.mxu0 %v3409_v22  ;;  %v3425_v21 = vpack.c.bf16 %v2652_v20, %v2651_v43 }
 0xbec   : > { %3343 = vmatmul.mubr.msk.f32.vlgmr.msra.gmra.mrb[18].mxu1 %vm1026_vm3, %v2215_v17  ;;  %v2649_v17 = vld [vmem:[%s4333_s20] sm:$0xff] }
 0xbed   : > { %3412 = vmatpush3.bf16.msra.mxu0 %v3409_v22  ;;  %3416 = vmatpush3.bf16.msra.mxu1 %v3413_v0  ;;  %v3421_v19 = vpack.c.bf16 %v2650_v18, %v2649_v17  ;;  %v2653_v22 = vld [vmem:[%s4333_s20 + $0x20] sm:$0xff] }
 0xbee   : > { %3418 = vmatprep.subr.bf16.mxu1 %v3417_v38  ;;  %v3177_v17 = vld [vmem:[%s847_s18] ss:$0 sm:$0xff] }
 0xbef   : > { %3422 = vmatprep.subr.bf16.mxu0 %v3421_v19 }
 0xbf1   : > { %3420 = vmatpush3.bf16.msra.mxu1 %v3417_v38 }
 0xcbb   : > { %v2288_v23 = vpop.f32.mrb[12].mxu0 }
 0xcbc   : > { %2386 = vrot.lane.b32.xlu0 %v2288_v23, %s3914_s27  ;;  %v3339_v24 = vpop.f32.mrb[13].mxu0  ;;  %v2654_v23 = vld [vmem:[%s4333_s20 + $0x28] sm:$0xff] }
 0xcbd   : > { %v3429_v24 = vpack.c.bf16 %v2654_v23, %v2653_v22  ;;  %v2803_v22 = vld [vmem:[%s4730_s11] sm:$0xff] (!%p3178_p10)  ;;  %v2804_v23 = vld [vmem:[%s4730_s11 + $0x8] sm:$0xff] (!%p3178_p10) }
 0xcbf   : > { %v2364_v25 = vpop.f32.mrb[18].mxu1 }
 0xcc0   : > { %2388 = vrot.lane.b32.xlu1 %v2364_v25, %s3914_s27  ;;  %v3344_v26 = vpop.f32.mrb[19].mxu1  ;;  %v2655_v25 = vld [vmem:[%s4333_s20 + $0x30] sm:$0xff] }
 0xcc1   : > { %v2656_v26 = vld [vmem:[%s4333_s20 + $0x38] sm:$0xff] }
 0xcc2   : > { %v3433_v27 = vpack.c.bf16 %v2656_v26, %v2655_v25  ;;  %v3915_v25 = vmov (!%p3178_p10), 0.0|0.0   ;;  %v3438_v26 = vpack.c.bf16 (!%p3178_p10), %v2804_v23, %v2803_v22 }
 0xd2e   : > { %v2387_v36 = vpop.permute.xlu0 %2386 }
 0xd2f   : > { %v2398_v39 = vsel %vm2397_vm4, %v2395_v34, %v2387_v36 }
 0xd30   : > { %3353 = vmatprep.mubr.msk.f32.mxu0 %vm915_vm1, %v2398_v39 }
 0xd32   : > { %v2389_v44 = vpop.permute.xlu1 %2388 }
 0xd33   : > { %v2399_v45 = vsel %vm2397_vm4, %v2396_v41, %v2389_v44 }
 0xd34   : > { %3354 = vmatmul.mubr.msk.f32.vlgmr.msra.gmra.mrb[14].mxu0 %vm915_vm1, %v2399_v45 }
 0xd35   : > { %3424 = vmatpush3.bf16.msra.mxu0 %v3421_v19 }
 0xd36   : > { %3426 = vmatprep.subr.bf16.mxu0 %v3425_v21 }
 0xd39   : > { %3428 = vmatpush3.bf16.msra.mxu0 %v3425_v21 }
 0xd3a   : > { %3430 = vmatprep.subr.bf16.mxu0 %v3429_v24 }
 0xd3d   : > { %3432 = vmatpush3.bf16.msra.mxu0 %v3429_v24  ;;  %v2805_v24 = vld [vmem:[%s4730_s11 + $0x10] sm:$0xff] (!%p3178_p10) }
 0xd3e   : > { %3434 = vmatprep.subr.bf16.mxu0 %v3433_v27 }
 0xd41   : > { %3436 = vmatpush3.bf16.msra.mxu0 %v3433_v27  ;;  %v2806_v27 = vld [vmem:[%s4730_s11 + $0x18] sm:$0xff] (!%p3178_p10) }
 0xd42   : > { %3437 = vmatprep.subr.bf16.mxu0 (!%p3178_p10), %v3915_v25 }
 0xe07   : > { %v3355_v47 = vpop.f32.mrb[14].mxu0 }
 0xe08   : > { %v2489_v48 = vadd.f32 %v3355_v47, %v3165_v46  ;;  %v2483_v30 = vpop.f32.mrb[15].mxu0 }
 0xe09   : > { %v2484_v49 = vadd.f32 %v3165_v46, %v2483_v30 }
 0xe0a   : > { %v2493_v50 = vadd.f32 %v2489_v48, %v4364_v37 }
 0xe0b   : > { %v2492_v51 = vadd.f32 %v2484_v49, %v4360_v35 }
 0xe0c   : > { %v2499_v52 = vsel %vm915_vm1, %v2493_v50, 0.0 }
 0xe0d   : > { %2500 = vadd.xlane.f32.xlu1 %v2499_v52  ;;  %v2496_v32 = vsel %vm915_vm1, %v2492_v51, 0.0 }
 0xe0e   : > { %2497 = vadd.xlane.f32.xlu0 %v2496_v32 }
 0xe9a   : > { %v2501_v53 = vpop.xlane.xlu1 %2500 }
 0xe9b   : > { %v2504_v54 = vmul.f32 0.03125, %v2501_v53  ;;  %v2498_v55 = vpop.xlane.xlu0 %2497 }
 0xe9c   : > { %v2503_v56 = vmul.f32 0.03125, %v2498_v55 }
 0xe9d   : > { %v2506_v57 = vsub.f32 %v2493_v50, %v2504_v54 }
 0xe9e   : > { %v2505_v58 = vsub.f32 %v2492_v51, %v2503_v56  ;;  %v3173_v56 = vld [vmem:[%s841_s3] ss:$0 sm:$0xff] }
 0xe9f   : > { %v2508_v35 = vmul.f32 %v2506_v57, %v2506_v57 }
 0xea0   : > { %v2507_v60 = vmul.f32 %v2505_v58, %v2505_v58 }
 0xea1   : > { %v2512_v61 = vsel %vm915_vm1, %v2508_v35, 0.0 }
 0xea2   : > { %v2509_v37 = vsel %vm915_vm1, %v2507_v60, 0.0 }
 0xea3   : > { %2510 = vadd.xlane.f32.xlu0 %v2509_v37 }
 0xea7   : > { %2513 = vadd.xlane.f32.xlu0 %v2512_v61 }
 0xf30   : > { %v2511_v59 = vpop.xlane.xlu0 %2510 }
 0xf31   : > { %v2515_v4 = vmul.f32 0.03125, %v2511_v59 }
 0xf33   : > { %v2517_v5 = vadd.f32 1e-12, %v2515_v4 }
 0xf34   : > { %v2514_v6 = vpop.xlane.xlu0 %2513 }
 0xf35   : > { %3593 = vrsqrt.f32 %v2517_v5  ;;  %v2516_v1 = vmul.f32 0.03125, %v2514_v6 }
 0xf37   : > { %v2518_v7 = vadd.f32 1e-12, %v2516_v1 }
 0xf39   : > { %3595 = vrsqrt.f32 %v2518_v7 }
 0xf3f   : > { %v3594_v8 = vpop.eup %3593 }
 0xf40   : > { %v2521_v10 = vmul.f32 %v3594_v8, %v2505_v58 }
 0xf42   : > { %v2529_v11 = vmul.f32 %v3168_v42, %v2521_v10 }
 0xf43   : > { %v3596_v12 = vpop.eup %3595 }
 0xf44   : > { %v2522_v13 = vmul.f32 %v3596_v12, %v2506_v57  ;;  %v2537_v14 = vadd.f32 %v3169_v9, %v2529_v11 }
 0xf46   : > { %v2530_v15 = vmul.f32 %v3168_v42, %v2522_v13  ;;  %3364 = vmatprep.mubr.msk.f32.mxu1 %vm915_vm1, %v2537_v14 }
 0xf48   : > { %v2538_v16 = vadd.f32 %v3169_v9, %v2530_v15 }
 0xf4a   : > { %3365 = vmatmul.mubr.msk.f32.vlgmr.msra.gmra.mrb[20].mxu1 %vm915_vm1, %v2538_v16 }
0x101d   : > { %v3366_v29 = vpop.f32.mrb[20].mxu1 }
0x101e   : > { %v2628_v31 = vadd.f32 %v3366_v29, %v3170_v28  ;;  %v2622_v33 = vpop.f32.mrb[21].mxu1  ;;  %v3441_v29 = vpack.c.bf16 (!%p3178_p10), %v2806_v27, %v2805_v24 }
0x101f   : > { %v2623_v34 = vadd.f32 %v3170_v28, %v2622_v33  ;;  %v3917_v28 = vmov (!%p3178_p10), 0.0  }
0x1020   : > { %v2632_v36 = vmul.f32 %v2628_v31, %v2628_v31 }
0x1021   : > { %v2631_v39 = vmul.f32 %v2623_v34, %v2623_v34 }
0x1022   : > { %v2634_v40 = vmul.f32 %v2632_v36, %v2628_v31 }
0x1023   : > { %v2633_v41 = vmul.f32 %v2631_v39, %v2623_v34 }
0x1024   : > { %v2636_v44 = vmul.f32 0.044715, %v2634_v40 }
0x1025   : > { %v2635_v45 = vmul.f32 0.044715, %v2633_v41 }
0x1026   : > { %v2638_v46 = vadd.f32 %v2636_v44, %v2628_v31 }
0x1027   : > { %v2637_v47 = vadd.f32 %v2635_v45, %v2623_v34 }
0x1028   : > { %v2640_v48 = vmul.f32 0.7978846, %v2638_v46 }
0x1029   : > { %v2639_v30 = vmul.f32 0.7978846, %v2637_v47 }
0x102a   : > { %3597 = vtanh.f32 %v2640_v48 }
0x102b   : > { %3599 = vtanh.f32 %v2639_v30 }
0x1034   : > { %v3598_v49 = vpop.eup %3597 }
0x1035   : > { %v3600_v50 = vpop.eup %3599  ;;  %v2644_v51 = vadd.f32 1.0, %v3598_v49 }
0x1036   : > { %v2643_v52 = vadd.f32 1.0, %v3600_v50 }
0x1037   : > { %v2646_v32 = vmul.f32 0.5, %v2644_v51 }
0x1038   : > { %v2645_v53 = vmul.f32 0.5, %v2643_v52 }
0x1039   : > { %v2648_v55 = vmul.f32 %v2646_v32, %v2628_v31 }
0x103a   : > { %v2647_v54 = vmul.f32 %v2645_v53, %v2623_v34  ;;  %v3179_v34 = vld [vmem:[%s4731_s17] ss:$0 sm:$0xff] (!%p3178_p10) }
0x103c   : > { %3383 = vmatprep.mubr.msk.f32.mxu0 %vm2664_vm6, %v2647_v54 }
0x103d   : > { %3384 = vmatmul.mubr.msk.f32.vlgmr.msra.gmra.mrb[16].mxu0 %vm2664_vm6, %v2648_v55 }
0x103e   : > { %3394 = vmatprep.mubr.msk.f32.mxu0 (!%p3178_p10), %vm3916_vm7, %v3917_v28  ;;  %3439 = vmatpush3.bf16.msra.mxu0 (!%p3178_p10), %v3438_v26 }
0x103f   : > { %3440 = vmatprep.subr.bf16.mxu0 (!%p3178_p10), %v3915_v25 }
0x1042   : > { %3442 = vmatpush3.bf16.msra.mxu0 (!%p3178_p10), %v3441_v29 }
0x1110   : > { %v3385_v57 = vpop.f32.mrb[16].mxu0 }
0x1111   : > { %v2743_v58 = vadd.f32 %v3385_v57, %v3173_v56  ;;  %v2737_v60 = vpop.f32.mrb[17].mxu0 }
0x1112   : > { %v2738_v37 = vadd.f32 %v3173_v56, %v2737_v60 }
0x1113   : > { %v2747_v35 = vadd.f32 %v2743_v58, %v2538_v16 }
0x1114   : > { %v2746_v61 = vadd.f32 %v2738_v37, %v2537_v14  ;;  %v3176_v14 = vld [vmem:[%s844_s2] ss:$0 sm:$0xff] }
0x1115   : > { %v2753_v62 = vsel %vm915_vm1, %v2747_v35, 0.0 }
0x1116   : > { %2754 = vadd.xlane.f32.xlu0 %v2753_v62  ;;  %v2750_v63 = vsel %vm915_vm1, %v2746_v61, 0.0 }
0x1117   : > { %2751 = vadd.xlane.f32.xlu1 %v2750_v63 }
0x11a3   : > { %v2755_v0 = vpop.xlane.xlu0 %2754 }
0x11a4   : > { %v2757_v2 = vmul.f32 0.03125, %v2755_v0  ;;  %v2752_v3 = vpop.xlane.xlu1 %2751 }
0x11a5   : > { %v2756_v38 = vmul.f32 0.03125, %v2752_v3 }
0x11a6   : > { %v2759_v59 = vsub.f32 %v2747_v35, %v2757_v2 }
0x11a7   : > { %v2758_v4 = vsub.f32 %v2746_v61, %v2756_v38 }
0x11a8   : > { %v2761_v5 = vmul.f32 %v2759_v59, %v2759_v59 }
0x11a9   : > { %v2760_v6 = vmul.f32 %v2758_v4, %v2758_v4 }
0x11aa   : > { %v2765_v1 = vsel %vm915_vm1, %v2761_v5, 0.0 }
0x11ab   : > { %2766 = vadd.xlane.f32.xlu0 %v2765_v1  ;;  %v2762_v7 = vsel %vm915_vm1, %v2760_v6, 0.0 }
0x11ac   : > { %2763 = vadd.xlane.f32.xlu1 %v2762_v7 }
0x1238   : > { %v2767_v8 = vpop.xlane.xlu0 %2766 }
0x1239   : > { %v2769_v42 = vmul.f32 0.03125, %v2767_v8  ;;  %v2764_v10 = vpop.xlane.xlu1 %2763 }
0x123a   : > { %v2768_v9 = vmul.f32 0.03125, %v2764_v10 }
0x123b   : > { %v2771_v11 = vadd.f32 1e-12, %v2769_v42 }
0x123c   : > { %v2770_v12 = vadd.f32 1e-12, %v2768_v9 }
0x123d   : > { %3601 = vrsqrt.f32 %v2771_v11 }
0x123e   : > { %3603 = vrsqrt.f32 %v2770_v12 }
0x1247   : > { %v3602_v13 = vpop.eup %3601 }
0x1248   : > { %v3604_v15 = vpop.eup %3603  ;;  %v2775_v16 = vmul.f32 %v3602_v13, %v2759_v59 }
0x1249   : > { %v2774_v18 = vmul.f32 %v3604_v15, %v2758_v4  ;;  %2797 = sbr.rel (%p3178_p10) target bundleno = 4915 (0x1333), region = 128 }
0x124a   : > { %v2783_v19 = vmul.f32 %v3176_v14, %v2775_v16 }
0x124b   : > { %v2782_v43 = vmul.f32 %v3176_v14, %v2774_v18 }
0x124c   : > { %v2791_v20 = vadd.f32 %v3177_v17, %v2783_v19 }
0x124d   : > { %v2790_v21 = vadd.f32 %v3177_v17, %v2782_v43 }
0x124e   : > { %2793 = vst.msk [vmem:[#allocation2 + $0x8] sm:$0xff] %vm915_vm1, %v2791_v20  ;;  %v2799_v31 = vrot.slane (!%p3178_p10), %v2791_v20, 7 }
0x124f   : > { %2792 = vst.msk [vmem:[#allocation2] sm:$0xff] %vm915_vm1, %v2790_v21 }
0x1250   : > { %v2802_v33 = vsel %vm2801_vm8, %v2790_v21, %v2799_v31 }
0x1251   : > { %3395 = vmatmul.mubr.msk.f32.vlgmr.msra.gmra.mrb[0].mxu0 %vm915_vm1, %v2802_v33 }
0x1324   : > { %v2883_v36 = vpop.f32.mrb[0].mxu0 }
0x1325   : > { %v2884_v39 = vadd.f32 %v3179_v34, %v2883_v36  ;;  %v3396_v40 = vpop.f32.mrb[1].mxu0 }
0x1327   : > { %3605 = vtanh.f32 %v2884_v39 }
0x1331   : > { %v3606_v41 = vpop.eup %3605 }
0x1332   : > { %2889 = vst.msk [vmem:[#allocation15] sm:$0x3] %vm2888_vm9, %v3606_v41 }
0x1333 PF: > { %p3497_p2 = scmp.eq.s32.totalorder %s4033_s0, 1  ;;  %s3918_s21 = smov [#allocation15]  }
0x1334   : > { %s2897_s6 = sshll.u32 %s3918_s21, 4  ;;  %s2898_s6 = int_to_ptr.vmem [resolvable:$true] %s2897_s6 }
0x1335   : > { %s3811_s26 = scalar_lea.vmem %s2898_s6, 32  ;;  %p3818_p7 = scmp.lt.s32.totalorder %s2898_s6, %s2898_s6 }
0x1336   : > { %p3812_p6 = scmp.ne.s32.totalorder %s2898_s6, %s3811_s26  ;;  %p3819_p0 = scmp.lt.s32.totalorder %s3811_s26, %s3811_s26 }
0x1338   : > { %p3813_p11 = pnand %p3812_p6, %p3497_p2  ;;  %p3820_p5 = por %p3819_p0, %p3818_p7 }
0x133a   : > { %p3814_p3 = pneg %p3813_p11 }
0x133c   : > { %p3821_p8 = pnand %p3820_p5, %p3814_p3 }
0x133e   : > { %3824 = shalt.err (!%p3821_p8)
}
0x133f   : > { %s4732_s10 = sld [smem:[#allocation40_spill]] }
0x1345   : > { %s3825_s23 = scalar_lea.hbm %s4732_s10, 32 }
0x1346   : > { %p3826_p12 = scmp.ne.s32.totalorder %s4732_s10, %s3825_s23  ;;  %p3831_p1 = scmp.lt.u32.totalorder %s3825_s23, %s4732_s10 }
0x1348   : > { %p3827_p9 = pnand %p3826_p12, %p3497_p2 }
0x134a   : > { %p3828_p4 = pneg %p3827_p9 }
0x134c   : > { %p3833_p13 = pnand %p3831_p1, %p3828_p4 }
0x134e   : > { %3836 = shalt.err (!%p3833_p13)
}
0x134f   : > { %3464 = dma.vmem_to_hbm [thread:$0]  (%p3497_p2), %s2898_s6, 32, %s4732_s10, [#allocation5]  }
0x1350   : > { %3870 = dma.done.wait (%p3497_p2), [#allocation5], 32  }
0x1351   : > { %3872 = vsyncadd (%p3497_p2), [#allocation5], 4294967264 }
0x1352 PF: > { %s4733_s30 = sld [smem:[#allocation22_spill]]  ;;  %s4734_s2 = sld [smem:[#allocation21_spill]] }
0x1353   : > { %s4735_s29 = sld [smem:[#allocation23_spill]]  ;;  %s4736_s27 = smov %s3879_s28 }
0x1358   : > { %p34_p10 = scmp.ge.s32.totalorder %s4733_s30, 4   ;;  %s4737_s28 = smov %s4734_s2 }
0x135a   :  { %36 = sbr.rel (!%p34_p10) target bundleno = 26 (0x1a), region = 209 }
0x1361   :  { %2910 = vsyncpa [#allocation4], 1 }
0x1362   :  { %2912 = vsyncpa [#allocation4 + $0x1], 1 }
0x1363   :  { %2913 = vsyncpa [#allocation7], 1 }
0x1364   :  { %2914 = vsyncpa [#allocation10], 1 }
0x1365   :  { %2916 = vsyncpa [#allocation10 + $0x1], 1 }
0x1366   :  { %2917 = vsyncpa [#allocation13], 1 }
0x1367   :  { %2919 = vsyncpa [#allocation13 + $0x1], 1 }
0x1368   :  { %2920 = vsyncpa [#allocation5], 1 }
0x1369   :  { %2922 = vsyncpa [#allocation5 + $0x1], 1 }

</bundles_post_ra>
